<compile_context>
chip_gen: v7x
topology: tpu7x:2x2x1
jax: 0.10.0
libtpu: 0.0.40
codegen_flags: <defaults>
</compile_context>

<pallas_src>
import jax
import jax.numpy as jnp
from jax.experimental import pallas as pl
from jax.experimental.pallas import tpu as pltpu

IN_F = 2048
HID_F = 1024
OUT_F = 7
PAD_OUT = 128          # fc3 output padded to one full lane group
BN_EPS = 1e-5

TK = 512               # reduction (K) tile for fc2 -> 4 pipelined weight blocks


def predictor_kernel(x_ref, w2_ref, bnp_ref, w3_ref, o_ref, acc_ref):
    k = pl.program_id(0)

    # fc2 partial product: (N, TK) f32 -> bf16 @ (TK, 1024) bf16 -> f32 acc.
    partial = jnp.dot(x_ref[...].astype(jnp.bfloat16), w2_ref[...],
                      preferred_element_type=jnp.float32)

    @pl.when(k == 0)
    def _():
        acc_ref[...] = partial

    @pl.when(k != 0)
    def _():
        acc_ref[...] += partial

    @pl.when(k == pl.num_programs(0) - 1)
    def _():
        b2 = bnp_ref[0:1, :]                 # (1, 1024)
        gamma = bnp_ref[1:2, :]
        beta = bnp_ref[2:3, :]
        b3 = bnp_ref[3:4, :PAD_OUT]          # (1, 128), real bias in [:7]

        h = acc_ref[...] + b2                                # (N, 1024) f32
        # BatchNorm1d, training mode: batch mean, biased variance, affine.
        mean = jnp.mean(h, axis=0, keepdims=True)
        centered = h - mean
        var = jnp.mean(centered * centered, axis=0, keepdims=True)
        hn = centered * jax.lax.rsqrt(var + BN_EPS) * gamma + beta
        hr = jnp.maximum(hn, 0.0)                            # ReLU
        # fc3 (lane-dense padded to 128) + bias, all in-kernel.
        out = jnp.dot(hr.astype(jnp.bfloat16), w3_ref[...],
                      preferred_element_type=jnp.float32) + b3
        o_ref[...] = out


def predictor_forward(x, params):
    """x: (N, 2048) float32 (N multiple of 8).  params: see init_params."""
    n = x.shape[0]
    assert n % 8 == 0, "batch must be a multiple of 8 (sublane granularity)"
    nk = IN_F // TK

    out_padded = pl.pallas_call(
        predictor_kernel,
        out_shape=jax.ShapeDtypeStruct((n, PAD_OUT), jnp.float32),
        grid_spec=pltpu.PrefetchScalarGridSpec(
            num_scalar_prefetch=0,
            grid=(nk,),
            in_specs=[
                pl.BlockSpec((n, TK), lambda k: (0, k)),            # x (f32)
                pl.BlockSpec((TK, HID_F), lambda k: (k, 0)),        # w2_t (bf16)
                pl.BlockSpec((4, HID_F), lambda k: (0, 0)),         # b2/gamma/beta/b3
                pl.BlockSpec((HID_F, PAD_OUT), lambda k: (0, 0)),   # w3_t (bf16, padded)
            ],
            out_specs=pl.BlockSpec((n, PAD_OUT), lambda k: (0, 0)),
            scratch_shapes=[pltpu.VMEM((n, HID_F), jnp.float32)],
        ),
        compiler_params=pltpu.CompilerParams(
            dimension_semantics=("arbitrary",)),
    )(x, params["w2_t"], params["bn_pack"], params["w3_t"])

    # Drop the lane pad: only the first 7 logits are real.
    return out_padded[:, :OUT_F]


def init_params(key):
    """Deterministic synthetic parameters (shapes match the nn.Module)."""
    k2w, k2b, k3w, k3b, kg, kb = jax.random.split(key, 6)
    # nn.Linear default init: U(-1/sqrt(fan_in), 1/sqrt(fan_in))
    lim2 = 1.0 / jnp.sqrt(IN_F)
    lim3 = 1.0 / jnp.sqrt(HID_F)
    w2 = jax.random.uniform(k2w, (HID_F, IN_F), jnp.float32, -lim2, lim2)
    b2 = jax.random.uniform(k2b, (HID_F,), jnp.float32, -lim2, lim2)
    w3 = jax.random.uniform(k3w, (OUT_F, HID_F), jnp.float32, -lim3, lim3)
    b3 = jax.random.uniform(k3b, (OUT_F,), jnp.float32, -lim3, lim3)
    # BatchNorm1d affine: defaults gamma=1, beta=0 — perturbed deterministically
    # so the affine path is exercised.
    gamma = 1.0 + 0.01 * jax.random.normal(kg, (HID_F,), jnp.float32)
    beta = 0.01 * jax.random.normal(kb, (HID_F,), jnp.float32)

    # Pack small per-feature params into one array: rows = [b2, gamma, beta, b3pad].
    bn_pack = jnp.zeros((4, HID_F), jnp.float32)
    bn_pack = bn_pack.at[0].set(b2)
    bn_pack = bn_pack.at[1].set(gamma)
    bn_pack = bn_pack.at[2].set(beta)
    bn_pack = bn_pack.at[3, :OUT_F].set(b3)

    # fc3 weight pre-transposed and zero-padded to 128 output lanes.
    w3_t_padded = jnp.zeros((HID_F, PAD_OUT), jnp.float32).at[:, :OUT_F].set(w3.T)
    return {
        "w2_t": w2.T.astype(jnp.bfloat16),         # (2048, 1024) bf16
        "bn_pack": bn_pack,                        # (4, 1024) f32
        "w3_t": w3_t_padded.astype(jnp.bfloat16),  # (1024, 128) bf16
    }


def predictor_ref(x, params):
    """Pure-JAX reference mirroring the kernel's bf16 matmul inputs."""
    xb = x.astype(jnp.bfloat16)
    b2 = params["bn_pack"][0:1]
    gamma = params["bn_pack"][1:2]
    beta = params["bn_pack"][2:3]
    b3 = params["bn_pack"][3:4, :OUT_F]
    h = jnp.dot(xb, params["w2_t"], preferred_element_type=jnp.float32) + b2
    mean = jnp.mean(h, axis=0, keepdims=True)
    centered = h - mean
    var = jnp.mean(centered * centered, axis=0, keepdims=True)
    hn = centered * jax.lax.rsqrt(var + BN_EPS) * gamma + beta
    hr = jnp.maximum(hn, 0.0)
    out = jnp.dot(hr.astype(jnp.bfloat16), params["w3_t"],
                  preferred_element_type=jnp.float32)
    return out[:, :OUT_F] + b3


if __name__ == "__main__":
    key = jax.random.PRNGKey(0)
    kx, kp = jax.random.split(key)

    batch = 8
    x = jax.random.normal(kx, (batch, IN_F), jnp.float32)
    params = init_params(kp)

    out = predictor_forward(x, params)
    out = jax.block_until_ready(out)

    ref = predictor_ref(x, params)
    assert out.shape == (batch, OUT_F), out.shape
    err = float(jnp.max(jnp.abs(out - ref)))
    assert jnp.allclose(out, ref, atol=1e-2, rtol=1e-2), err

    print("KERNEL_OK")
</pallas_src>

<mosaic_0001>
module attributes {stable_mosaic.version = 11 : i64} {
  func.func @predictor_kernel(%arg0: i32, %arg1: memref<8x512xf32, #tpu.memory_space<vmem>>, %arg2: memref<512x1024xbf16, #tpu.memory_space<vmem>>, %arg3: memref<4x1024xf32, #tpu.memory_space<vmem>>, %arg4: memref<1024x128xbf16, #tpu.memory_space<vmem>>, %arg5: memref<8x128xf32, #tpu.memory_space<vmem>>, %arg6: memref<8x1024xf32, #tpu.memory_space<vmem>>) attributes {dimension_semantics = [#tpu.dimension_semantics<arbitrary>], iteration_bounds = array<i64: 4>, scalar_prefetch = 0 : i64, scratch_operands = 1 : i64, tpu.core_type = #tpu.core_type<tc>, window_params = [{transform_indices = @transform_0, window_bounds = array<i64: 8, 512>}, {transform_indices = @transform_1, window_bounds = array<i64: 512, 1024>}, {pipeline_mode = #tpu.pipeline_mode<synchronous>, transform_indices = @transform_2, window_bounds = array<i64: 4, 1024>}, {pipeline_mode = #tpu.pipeline_mode<synchronous>, transform_indices = @transform_3, window_bounds = array<i64: 1024, 128>}, {pipeline_mode = #tpu.pipeline_mode<synchronous>, transform_indices = @transform_4, window_bounds = array<i64: 8, 128>}]} {
    %c0 = arith.constant 0 : index
    %c0_0 = arith.constant 0 : index
    %0 = vector.load %arg1[%c0, %c0_0] : memref<8x512xf32, #tpu.memory_space<vmem>>, vector<8x512xf32>
    %1 = arith.truncf %0 : vector<8x512xf32> to vector<8x512xbf16>
    %c0_1 = arith.constant 0 : index
    %c0_2 = arith.constant 0 : index
    %2 = vector.load %arg2[%c0_1, %c0_2] : memref<512x1024xbf16, #tpu.memory_space<vmem>>, vector<512x1024xbf16>
    %cst = arith.constant dense<0.000000e+00> : vector<8x1024xf32>
    %3 = tpu.matmul %1, %2, %cst {dimension_numbers = #tpu.dot_dimension_numbers<[1], [0], [0], [1], [0, 0, 1, 1], [], []>} : vector<8x512xbf16>, vector<512x1024xbf16>, vector<8x1024xf32> -> vector<8x1024xf32>
    %c0_i32 = arith.constant 0 : i32
    %4 = arith.cmpi eq, %arg0, %c0_i32 : i32
    %5 = arith.extui %4 : i1 to i32
    %c0_i32_3 = arith.constant 0 : i32
    %6 = arith.cmpi ne, %5, %c0_i32_3 : i32
    scf.if %6 {
      %c0_7 = arith.constant 0 : index
      %c0_8 = arith.constant 0 : index
      %13 = vector.load %arg6[%c0_7, %c0_8] : memref<8x1024xf32, #tpu.memory_space<vmem>>, vector<8x1024xf32>
      tpu.vector_store %arg6[%c0_7, %c0_8], %3 {strides = array<i32>} : memref<8x1024xf32, #tpu.memory_space<vmem>>, vector<8x1024xf32>,
    } else {
    }
    %c0_i32_4 = arith.constant 0 : i32
    %7 = arith.cmpi ne, %arg0, %c0_i32_4 : i32
    %8 = arith.extui %7 : i1 to i32
    %c0_i32_5 = arith.constant 0 : i32
    %9 = arith.cmpi ne, %8, %c0_i32_5 : i32
    scf.if %9 {
      %c0_7 = arith.constant 0 : index
      %c0_8 = arith.constant 0 : index
      %13 = vector.load %arg6[%c0_7, %c0_8] : memref<8x1024xf32, #tpu.memory_space<vmem>>, vector<8x1024xf32>
      %14 = arith.addf %13, %3 : vector<8x1024xf32>
      %c0_9 = arith.constant 0 : index
      %c0_10 = arith.constant 0 : index
      %15 = vector.load %arg6[%c0_9, %c0_10] : memref<8x1024xf32, #tpu.memory_space<vmem>>, vector<8x1024xf32>
      tpu.vector_store %arg6[%c0_9, %c0_10], %14 {strides = array<i32>} : memref<8x1024xf32, #tpu.memory_space<vmem>>, vector<8x1024xf32>,
    } else {
    }
    %c3_i32 = arith.constant 3 : i32
    %10 = arith.cmpi eq, %arg0, %c3_i32 : i32
    %11 = arith.extui %10 : i1 to i32
    %c0_i32_6 = arith.constant 0 : i32
    %12 = arith.cmpi ne, %11, %c0_i32_6 : i32
    scf.if %12 {
      %c0_7 = arith.constant 0 : index
      %c0_8 = arith.constant 0 : index
      %13 = vector.load %arg3[%c0_7, %c0_8] : memref<4x1024xf32, #tpu.memory_space<vmem>>, vector<1x1024xf32>
      %c1 = arith.constant 1 : index
      %c0_9 = arith.constant 0 : index
      %14 = vector.load %arg3[%c1, %c0_9] : memref<4x1024xf32, #tpu.memory_space<vmem>>, vector<1x1024xf32>
      %c2 = arith.constant 2 : index
      %c0_10 = arith.constant 0 : index
      %15 = vector.load %arg3[%c2, %c0_10] : memref<4x1024xf32, #tpu.memory_space<vmem>>, vector<1x1024xf32>
      %c3 = arith.constant 3 : index
      %c0_11 = arith.constant 0 : index
      %16 = vector.load %arg3[%c3, %c0_11] : memref<4x1024xf32, #tpu.memory_space<vmem>>, vector<1x128xf32>
      %c0_12 = arith.constant 0 : index
      %c0_13 = arith.constant 0 : index
      %17 = vector.load %arg6[%c0_12, %c0_13] : memref<8x1024xf32, #tpu.memory_space<vmem>>, vector<8x1024xf32>
      %18 = vector.broadcast %13 : vector<1x1024xf32> to vector<8x1024xf32>
      %19 = arith.addf %17, %18 : vector<8x1024xf32>
      %cst_14 = arith.constant dense<0.000000e+00> : vector<1024xf32>
      %20 = vector.multi_reduction <add>, %19, %cst_14 [0] : vector<8x1024xf32> to vector<1024xf32>
      %21 = vector.shape_cast %20 : vector<1024xf32> to vector<1x1024xf32>
      %cst_15 = arith.constant 8.000000e+00 : f32
      %22 = vector.broadcast %cst_15 : f32 to vector<1x1024xf32>
      %23 = arith.divf %21, %22 : vector<1x1024xf32>
      %24 = vector.broadcast %23 : vector<1x1024xf32> to vector<8x1024xf32>
      %25 = arith.subf %19, %24 : vector<8x1024xf32>
      %26 = arith.mulf %25, %25 : vector<8x1024xf32>
      %cst_16 = arith.constant dense<0.000000e+00> : vector<1024xf32>
      %27 = vector.multi_reduction <add>, %26, %cst_16 [0] : vector<8x1024xf32> to vector<1024xf32>
      %28 = vector.shape_cast %27 : vector<1024xf32> to vector<1x1024xf32>
      %cst_17 = arith.constant 8.000000e+00 : f32
      %29 = vector.broadcast %cst_17 : f32 to vector<1x1024xf32>
      %30 = arith.divf %28, %29 : vector<1x1024xf32>
      %cst_18 = arith.constant 9.99999974E-6 : f32
      %31 = vector.broadcast %cst_18 : f32 to vector<1x1024xf32>
      %32 = arith.addf %30, %31 : vector<1x1024xf32>
      %33 = math.rsqrt %32 : vector<1x1024xf32>
      %34 = vector.broadcast %33 : vector<1x1024xf32> to vector<8x1024xf32>
      %35 = arith.mulf %25, %34 : vector<8x1024xf32>
      %36 = vector.broadcast %14 : vector<1x1024xf32> to vector<8x1024xf32>
      %37 = arith.mulf %35, %36 : vector<8x1024xf32>
      %38 = vector.broadcast %15 : vector<1x1024xf32> to vector<8x1024xf32>
      %39 = arith.addf %37, %38 : vector<8x1024xf32>
      %cst_19 = arith.constant 0.000000e+00 : f32
      %40 = vector.broadcast %cst_19 : f32 to vector<8x1024xf32>
      %41 = arith.maximumf %39, %40 : vector<8x1024xf32>
      %42 = arith.truncf %41 : vector<8x1024xf32> to vector<8x1024xbf16>
      %c0_20 = arith.constant 0 : index
      %c0_21 = arith.constant 0 : index
      %43 = vector.load %arg4[%c0_20, %c0_21] : memref<1024x128xbf16, #tpu.memory_space<vmem>>, vector<1024x128xbf16>
      %cst_22 = arith.constant dense<0.000000e+00> : vector<8x128xf32>
      %44 = tpu.matmul %42, %43, %cst_22 {dimension_numbers = #tpu.dot_dimension_numbers<[1], [0], [0], [1], [0, 0, 1, 1], [], []>} : vector<8x1024xbf16>, vector<1024x128xbf16>, vector<8x128xf32> -> vector<8x128xf32>
      %45 = vector.broadcast %16 : vector<1x128xf32> to vector<8x128xf32>
      %46 = arith.addf %44, %45 : vector<8x128xf32>
      %c0_23 = arith.constant 0 : index
      %c0_24 = arith.constant 0 : index
      %47 = vector.load %arg5[%c0_23, %c0_24] : memref<8x128xf32, #tpu.memory_space<vmem>>, vector<8x128xf32>
      tpu.vector_store %arg5[%c0_23, %c0_24], %46 {strides = array<i32>} : memref<8x128xf32, #tpu.memory_space<vmem>>, vector<8x128xf32>,
    } else {
    }
    return
  }
  func.func @transform_0(%arg0: i32) -> (i32, i32) {
    %c0_i32 = arith.constant 0 : i32
    %c0_i32_0 = arith.constant 0 : i32
    return %c0_i32, %arg0 : i32, i32
  }
  func.func @transform_1(%arg0: i32) -> (i32, i32) {
    %c0_i32 = arith.constant 0 : i32
    %c0_i32_0 = arith.constant 0 : i32
    return %arg0, %c0_i32 : i32, i32
  }
  func.func @transform_2(%arg0: i32) -> (i32, i32) {
    %c0_i32 = arith.constant 0 : i32
    %c0_i32_0 = arith.constant 0 : i32
    %c0_i32_1 = arith.constant 0 : i32
    return %c0_i32, %c0_i32_0 : i32, i32
  }
  func.func @transform_3(%arg0: i32) -> (i32, i32) {
    %c0_i32 = arith.constant 0 : i32
    %c0_i32_0 = arith.constant 0 : i32
    %c0_i32_1 = arith.constant 0 : i32
    return %c0_i32, %c0_i32_0 : i32, i32
  }
  func.func @transform_4(%arg0: i32) -> (i32, i32) {
    %c0_i32 = arith.constant 0 : i32
    %c0_i32_0 = arith.constant 0 : i32
    %c0_i32_1 = arith.constant 0 : i32
    return %c0_i32, %c0_i32_0 : i32, i32
  }
}

</mosaic_0001>

<bundles_post_ra>
// kernel: tpu_custom_call.1
= control target key start
LH: loop header
LB: loop body
LE: loop exit
PB: predicated region body
PF: predicated region fallthrough
CT: control target
= control target key end

     0   :  { %9 = vsyncpa [#allocation4], 0  ;;  %s4786_s0 = inlined_call_operand.hbm [shape: f32[8,2048], index: 0, kind: input, shape index: {}]   ;;  %s4787_s1 = inlined_call_operand.hbm [shape: bf16[2048,1024], index: 1, kind: input, shape index: {}]   ;;  %s4788_s2 = inlined_call_operand.hbm [shape: f32[4,1024], index: 2, kind: input, shape index: {}]   ;;  %s4789_s3 = inlined_call_operand.hbm [shape: bf16[1024,128], index: 3, kind: input, shape index: {}]   ;;  %s4790_s4 = inlined_call_operand.hbm [shape: f32[8,128], index: 4, kind: output, shape index: {}]  }
   0x1   :  { %11 = vsyncpa [#allocation4 + $0x1], 0 }
   0x2   :  { %12 = vsyncpa [#allocation7], 0 }
   0x3   :  { %14 = vsyncpa [#allocation7 + $0x1], 0 }
   0x4   :  { %15 = vsyncpa [#allocation10], 0 }
   0x5   :  { %16 = vsyncpa [#allocation5], 0  ;;  %s4131_s15 = smov 0   ;;  %s4133_s16 = smov 0  }
   0x6   :  { %s4135_s17 = smov 0   ;;  %s4137_s18 = smov 0  }
   0x7 LB: > { %s4150_s19 = sadd.s32 4294967295, %s4095_s18   ;;  %p42_p0 = scmp.ne.s32.totalorder %s4087_s16, %s4083_s15  ;;  %s4095_s18 = sphi %s4137_s18, %s4809_s18   ;;  %s4091_s17 = sphi %s4135_s17, %s4808_s17   ;;  %s4087_s16 = sphi %s4133_s16, %s4807_s16   ;;  %s4083_s15 = sphi %s4131_s15, %s4806_s15  }
   0x8   : > { %p4791_p1 = scmp.eq.s32.totalorder %s4150_s19, 0  ;;  %p3296_p2 = scmp.ge.s32.totalorder %s4095_s18, 1 }
   0x9   : > { %p142_p3 = scmp.lt.s32.totalorder %s4095_s18, 5  ;;  %s4097_s22 = smov [#allocation8]  }
   0xa   : > { %p4159_p5 = por %p4791_p1, %p42_p0  ;;  %s155_s23 = sshll.u32 %s4097_s22, 4  ;;  %s156_s23 = int_to_ptr.vmem [resolvable:$true] %s155_s23 }
   0xb   : > { %p4163_p6 = pnand %p3296_p2, %p142_p3  ;;  %s4098_s24 = smov [#allocation9]  }
   0xc   : > { %s4794_s20 = scalar_select %p4159_p5, 1, 0 }
   0xd   : > { %s4795_s21 = scalar_select %p4163_p6, 1, 0 }
   0xe   : > { %p3763_p7 = pneg %p4163_p6  ;;  %s165_s25 = sshll.u32 %s4098_s24, 4  ;;  %s4175_s25 = int_to_ptr.vmem [resolvable:$true] %s165_s25 }
   0xf   : > { %s3903_s29 = scalar_lea.hbm %s4788_s2, 512 }
  0x10   : > { %p4171_p8 = pnand %p3763_p7, %p4791_p1  ;;  %p3904_p9 = scmp.ne.s32.totalorder %s4788_s2, %s3903_s29 }
  0x11   : > { %p3910_p13 = scmp.lt.u32.totalorder %s3903_s29, %s4788_s2 }
  0x12   : > { %p3905_p10 = pneg %p4171_p8 }
  0x14   : > { %p3906_p11 = pnand %p3905_p10, %p3904_p9 }
  0x16   : > { %p3907_p12 = pneg %p3906_p11 }
  0x18   : > { %p3912_p0 = pnand %p3910_p13, %p3907_p12 }
  0x1a   : > { %3915 = shalt.err (!%p3912_p0)
}
  0x1b   : > { %s3916_s8 = scalar_lea.vmem %s156_s23, 512  ;;  %p3924_p4 = scmp.lt.s32.totalorder %s156_s23, %s156_s23 }
  0x1c   : > { %p3917_p2 = scmp.ne.s32.totalorder %s156_s23, %s3916_s8  ;;  %p3925_p1 = scmp.lt.s32.totalorder %s3916_s8, %s3916_s8 }
  0x1e   : > { %p3919_p3 = pnand %p3917_p2, %p3905_p10  ;;  %p3926_p5 = por %p3925_p1, %p3924_p4 }
  0x20   : > { %p3920_p7 = pneg %p3919_p3 }
  0x22   : > { %p3927_p6 = pnand %p3926_p5, %p3920_p7 }
  0x24   : > { %3930 = shalt.err (!%p3927_p6)
}
  0x25   : > { %3766 = dma.hbm_to_vmem [thread:$0]  (!%p4171_p8), %s4788_s2, 512, %s156_s23, [#allocation7]  }
  0x26   : > { %s3931_s13 = scalar_lea.hbm %s4789_s3, 8192 }
  0x27   : > { %p3932_p9 = scmp.ne.s32.totalorder %s4789_s3, %s3931_s13  ;;  %p3938_p5 = scmp.lt.u32.totalorder %s3931_s13, %s4789_s3 }
  0x29   : > { %p3934_p1 = pnand %p3932_p9, %p3905_p10 }
  0x2b   : > { %p3935_p4 = pneg %p3934_p1 }
  0x2d   : > { %p3940_p6 = pnand %p3938_p5, %p3935_p4 }
  0x2f   : > { %3943 = shalt.err (!%p3940_p6)
}
  0x30   : > { %s3944_s23 = scalar_lea.vmem %s4175_s25, 8192  ;;  %p3952_p0 = scmp.lt.s32.totalorder %s4175_s25, %s4175_s25 }
  0x31   : > { %p3945_p11 = scmp.ne.s32.totalorder %s4175_s25, %s3944_s23  ;;  %p3953_p2 = scmp.lt.s32.totalorder %s3944_s23, %s3944_s23 }
  0x33   : > { %p3947_p12 = pnand %p3945_p11, %p3905_p10  ;;  %p3954_p3 = por %p3953_p2, %p3952_p0 }
  0x35   : > { %p3948_p13 = pneg %p3947_p12 }
  0x37   : > { %p3955_p7 = pnand %p3954_p3, %p3948_p13 }
  0x39   : > { %3958 = shalt.err (!%p3955_p7)
}
  0x3a   : > { %s4099_s27 = smov 64   ;;  %s4100_s28 = smov 4  }
  0x3b   : > { %3769 = dma.hbm_to_vmem [thread:$0]  (!%p4171_p8), %s4789_s3, 8192, %s4175_s25, [#allocation10], %s4099_s27, %s4099_s27, %s4100_s28  }
  0x3c   : > { %s4225_s5 = sadd.s32 1, %s4095_s18   ;;  %s29_s6 = sadd.s32 1, %s4091_s17 }
  0x3d   : > { %s26_s7 = ssub.s32 %s4095_s18, %s4225_s5  ;;  %p36_p10 = scmp.ne.s32.totalorder %s4091_s17, %s4087_s16 }
  0x3e   : > { %p27_p9 = scmp.eq.s32.totalorder %s26_s7, 0  ;;  %p37_p1 = scmp.eq.s32.totalorder %s4095_s18, 0 }
  0x3f   : > { %p3779_p4 = scmp.lt.s32.totalorder %s4095_s18, 4  ;;  %s4235_s8 = sand.u32 1, %s4091_s17  }
  0x40   : > { %s4238_s9 = scalar_select %p27_p9, %s4091_s17, %s29_s6  }
  0x41   : > { %p38_p5 = por %p37_p1, %p36_p10  ;;  %s3300_s26 = sshll.u32 %s4235_s8, 5 }
  0x42   : > { %s3640_s10 = sshll.u32 %s4095_s18, 9  ;;  %s183_s13 = scalar_lea.vmem [#allocation3], %s3300_s26 }
  0x43   : > { %s4245_s12 = scalar_lea.hbm %s4786_s0, %s3640_s10  ;;  %s191_s14 = sshll.u32 %s183_s13, 4  ;;  %s4251_s14 = int_to_ptr.vmem [resolvable:$true] %s191_s14 }
  0x44   : > { %p4247_p8 = pnand %p3779_p4, %p38_p5  ;;  %s3303_s22 = sshll.u32 %s4235_s8, 11 }
  0x45   : > { %s180_s24 = scalar_lea.sflag [#allocation4], %s4235_s8  ;;  %s3959_s23 = scalar_lea.hbm %s4245_s12, 512 }
  0x46   : > { %p3960_p6 = scmp.ne.s32.totalorder %s4245_s12, %s3959_s23  ;;  %p3961_p11 = pneg %p4247_p8 }
  0x47   : > { %s3964_s29 = scalar_lea.hbm %s4786_s0, 2048  ;;  %p3965_p0 = scmp.lt.u32.totalorder %s4245_s12, %s4786_s0 }
  0x48   : > { %p3962_p12 = pnand %p3961_p11, %p3960_p6  ;;  %p3966_p2 = scmp.lt.u32.totalorder %s3964_s29, %s3959_s23 }
  0x49   : > { %p3968_p7 = scmp.lt.u32.totalorder %s3959_s23, %s4245_s12 }
  0x4a   : > { %p3963_p13 = pneg %p3962_p12  ;;  %p3967_p3 = por %p3966_p2, %p3965_p0 }
  0x4c   : > { %p3969_p10 = por %p3968_p7, %p3967_p3 }
  0x4e   : > { %p3970_p9 = pnand %p3969_p10, %p3963_p13 }
  0x50   : > { %3973 = shalt.err (!%p3970_p9)
}
  0x51   : > { %s3974_s7 = scalar_lea.vmem %s4251_s14, 512  ;;  %s4101_s26 = smov [#allocation3]  }
  0x52   : > { %p3975_p1 = scmp.ne.s32.totalorder %s4251_s14, %s3974_s7  ;;  %s3979_s10 = sshll.u32 %s4101_s26, 4  ;;  %s3980_s10 = int_to_ptr.vmem [resolvable:$false] %s3979_s10 }
  0x53   : > { %s3981_s25 = scalar_lea.vmem %s3980_s10, 1024  ;;  %p3982_p6 = scmp.lt.s32.totalorder %s4251_s14, %s3980_s10 }
  0x54   : > { %p3977_p4 = pnand %p3975_p1, %p3961_p11  ;;  %p3983_p12 = scmp.lt.s32.totalorder %s3981_s25, %s3974_s7 }
  0x56   : > { %p3978_p5 = pneg %p3977_p4  ;;  %p3984_p0 = por %p3983_p12, %p3982_p6 }
  0x58   : > { %p3985_p2 = pnand %p3984_p0, %p3978_p5 }
  0x5a   : > { %3988 = shalt.err (!%p3985_p2)
}
  0x5b   : > { %3773 = dma.hbm_to_vmem [thread:$0]  (!%p4247_p8), %s4245_s12, 512, %s4251_s14, %s180_s24  }
  0x5c   : > { %s202_s11 = scalar_lea.vmem [#allocation6], %s3303_s22  ;;  %s198_s23 = sand.u32 1, %s4095_s18  }
  0x5d   : > { %s210_s13 = sshll.u32 %s202_s11, 4  ;;  %s3642_s27 = sshll.u32 %s4095_s18, 15  ;;  %s4283_s13 = int_to_ptr.vmem [resolvable:$true] %s210_s13 }
  0x5e   : > { %s4289_s30 = scalar_lea.hbm %s4787_s1, %s3642_s27  ;;  %s4291_s6 = scalar_lea.sflag [#allocation7], %s198_s23 }
  0x5f   : > { %s3989_s7 = scalar_lea.hbm %s4289_s30, 32768  ;;  %s3994_s18 = scalar_lea.hbm %s4787_s1, 131072 }
  0x60   : > { %p3990_p13 = scmp.ne.s32.totalorder %s4289_s30, %s3989_s7  ;;  %p3995_p10 = scmp.lt.u32.totalorder %s4289_s30, %s4787_s1 }
  0x61   : > { %p3996_p9 = scmp.lt.u32.totalorder %s3994_s18, %s3989_s7  ;;  %p3998_p4 = scmp.lt.u32.totalorder %s3989_s7, %s4289_s30 }
  0x62   : > { %p3992_p3 = pnand %p3990_p13, %p3961_p11 }
  0x63   : > { %p3997_p1 = por %p3996_p9, %p3995_p10 }
  0x64   : > { %p3993_p7 = pneg %p3992_p3 }
  0x65   : > { %p3999_p5 = por %p3998_p4, %p3997_p1 }
  0x67   : > { %p4000_p6 = pnand %p3999_p5, %p3993_p7 }
  0x69   : > { %4003 = shalt.err (!%p4000_p6)
}
  0x6a   : > { %s4004_s24 = scalar_lea.vmem %s4283_s13, 32768  ;;  %s4102_s26 = smov [#allocation6]  }
  0x6b   : > { %p4005_p12 = scmp.ne.s32.totalorder %s4283_s13, %s4004_s24  ;;  %s4009_s10 = sshll.u32 %s4102_s26, 4  ;;  %s4010_s10 = int_to_ptr.vmem [resolvable:$false] %s4009_s10 }
  0x6c   : > { %s4011_s25 = scalar_lea.vmem %s4010_s10, 65536  ;;  %p4012_p13 = scmp.lt.s32.totalorder %s4283_s13, %s4010_s10 }
  0x6d   : > { %p4007_p0 = pnand %p4005_p12, %p3961_p11  ;;  %p4013_p3 = scmp.lt.s32.totalorder %s4011_s25, %s4004_s24 }
  0x6f   : > { %p4008_p2 = pneg %p4007_p0  ;;  %p4014_p10 = por %p4013_p3, %p4012_p13 }
  0x71   : > { %p4015_p9 = pnand %p4014_p10, %p4008_p2 }
  0x73   : > { %4018 = shalt.err (!%p4015_p9)
}
  0x74   : > { %s4103_s11 = smov 512   ;;  %s4104_s23 = smov 32  }
  0x75   : > { %3776 = dma.hbm_to_vmem [thread:$0]  (!%p4247_p8), %s4289_s30, 32768, %s4283_s13, %s4291_s6, %s4103_s11, %s4103_s11, %s4104_s23  }
  0x76   : > { %p4798_p11 = scmp.ne.s32.totalorder %s4795_s21, 0 }
  0x77   : > { %s224_s27 = sand.u32 (!%p4798_p11), 1, %s4087_s16   ;;  %p4799_p7 = scmp.ne.s32.totalorder (!%p4798_p11), %s4794_s20, 0 }
  0x78   : > { %222 = sbr.rel (%p4798_p11) target bundleno = 974 (0x3ce), region = 36  ;;  %s3308_s28 = sshll.u32 (!%p4798_p11), %s224_s27, 5 }
  0x79   : > { %s225_s29 = scalar_lea.sflag (!%p4798_p11), [#allocation4], %s224_s27  ;;  %s4320_s7 = scalar_lea.vmem (!%p4798_p11), [#allocation3], %s3308_s28 }
  0x7f   : > { %4062 = dma.done.wait (%p4799_p7), %s225_s29, 512  }
  0x80   : > { %4064 = vsyncadd (%p4799_p7), %s225_s29, 4294966784  ;;  %s233_s8 = sand.u32 1, %s4150_s19   ;;  %s3309_s15 = sshll.u32 %s224_s27, 11 }
  0x81   : > { %s234_s13 = scalar_lea.sflag [#allocation7], %s233_s8  ;;  %s4327_s30 = scalar_lea.vmem [#allocation6], %s3309_s15 }
  0x82   : > { %4066 = dma.done.wait (%p4799_p7), %s234_s13, 32768  }
  0x83   : > { %4068 = vsyncadd (%p4799_p7), %s234_s13, 4294934528  ;;  %p4800_p8 = scmp.eq.s32.totalorder %s4150_s19, 0 }
  0x85   : > { %4070 = dma.done.wait (%p4800_p8), [#allocation7], 512   ;;  %p4801_p1 = pmov %p4800_p8 }
  0x87   : > { %4072 = vsyncadd (%p4801_p1), [#allocation7], 4294966784  ;;  %p4802_p4 = pmov %p4801_p1 }
  0x88   : > { %p4803_p5 = pmov %p4801_p1 }
  0x89   : > { %4074 = dma.done.wait (%p4802_p4), [#allocation10], 8192  }
  0x8a   : > { %4076 = vsyncadd (%p4803_p5), [#allocation10], 4294959104  ;;  %v281_v0 = vld [vmem:[%s4327_s30] sm:$0xff]  ;;  %v282_v2 = vld [vmem:[%s4327_s30 + $0x8] sm:$0xff]  ;;  %p4804_p6 = scmp.ne.s32.totalorder %s4150_s19, 0 }
  0x8b   : > { %v285_v1 = vld [vmem:[%s4327_s30 + $0x20] sm:$0xff]  ;;  %v286_v4 = vld [vmem:[%s4327_s30 + $0x28] sm:$0xff] }
  0x8c   : > { %v3313_v3 = vcombine.high %v281_v0, %v285_v1  ;;  %v3312_v5 = vcombine.low %v281_v0, %v285_v1  ;;  %v289_v6 = vld [vmem:[%s4327_s30 + $0x40] sm:$0xff]  ;;  %v3315_v8 = vcombine.high %v282_v2, %v286_v4  ;;  %v3314_v9 = vcombine.low %v282_v2, %v286_v4  ;;  %v290_v11 = vld [vmem:[%s4327_s30 + $0x48] sm:$0xff] }
  0x8d   : > { %v293_v7 = vld [vmem:[%s4327_s30 + $0x60] sm:$0xff]  ;;  %v294_v12 = vld [vmem:[%s4327_s30 + $0x68] sm:$0xff] }
  0x8e   : > { %v3321_v10 = vcombine.high %v289_v6, %v293_v7  ;;  %v297_v13 = vld [vmem:[%s4327_s30 + $0x80] sm:$0xff]  ;;  %1817 = vmatprep.subr.bf16.mxu0 %v3313_v3  ;;  %v3323_v14 = vcombine.high %v290_v11, %v294_v12  ;;  %v298_v16 = vld [vmem:[%s4327_s30 + $0x88] sm:$0xff]  ;;  %1899 = vmatprep.subr.bf16.mxu1 %v3315_v8  ;;  %v3320_v18 = vcombine.low %v289_v6, %v293_v7 }
  0x8f   : > { %v301_v15 = vld [vmem:[%s4327_s30 + $0xa0] sm:$0xff]  ;;  %v302_v17 = vld [vmem:[%s4327_s30 + $0xa8] sm:$0xff]  ;;  %1818 = vmatpush1.bf16.msra.mxu0 %v3312_v5  ;;  %1900 = vmatpush1.bf16.msra.mxu1 %v3314_v9  ;;  %v3322_v19 = vcombine.low %v290_v11, %v294_v12 }
  0x90   : > { %1819 = vmatprep.subr.bf16.mxu0 %v3321_v10  ;;  %v3329_v20 = vcombine.high %v297_v13, %v301_v15  ;;  %1901 = vmatprep.subr.bf16.mxu1 %v3323_v14  ;;  %v3331_v21 = vcombine.high %v298_v16, %v302_v17  ;;  %v305_v22 = vld [vmem:[%s4327_s30 + $0xc0] sm:$0xff]  ;;  %v306_v24 = vld [vmem:[%s4327_s30 + $0xc8] sm:$0xff]  ;;  %v3328_v26 = vcombine.low %v297_v13, %v301_v15 }
  0x91   : > { %v309_v23 = vld [vmem:[%s4327_s30 + $0xe0] sm:$0xff]  ;;  %v310_v25 = vld [vmem:[%s4327_s30 + $0xe8] sm:$0xff]  ;;  %v3330_v27 = vcombine.low %v298_v16, %v302_v17 }
  0x92   : > { %v3337_v28 = vcombine.high %v305_v22, %v309_v23  ;;  %v3339_v29 = vcombine.high %v306_v24, %v310_v25  ;;  %v313_v30 = vld [vmem:[%s4327_s30 + $0x100] sm:$0xff]  ;;  %v314_v32 = vld [vmem:[%s4327_s30 + $0x108] sm:$0xff]  ;;  %v3336_v34 = vcombine.low %v305_v22, %v309_v23  ;;  %v3338_v35 = vcombine.low %v306_v24, %v310_v25 }
  0x93   : > { %1820 = vmatpush1.bf16.msra.mxu0 %v3320_v18  ;;  %1902 = vmatpush1.bf16.msra.mxu1 %v3322_v19  ;;  %v317_v31 = vld [vmem:[%s4327_s30 + $0x120] sm:$0xff]  ;;  %v318_v33 = vld [vmem:[%s4327_s30 + $0x128] sm:$0xff] }
  0x94   : > { %1821 = vmatprep.subr.bf16.mxu0 %v3329_v20  ;;  %1903 = vmatprep.subr.bf16.mxu1 %v3331_v21  ;;  %v3345_v36 = vcombine.high %v313_v30, %v317_v31  ;;  %v3347_v37 = vcombine.high %v314_v32, %v318_v33  ;;  %v321_v38 = vld [vmem:[%s4327_s30 + $0x140] sm:$0xff]  ;;  %v322_v40 = vld [vmem:[%s4327_s30 + $0x148] sm:$0xff]  ;;  %v3344_v42 = vcombine.low %v313_v30, %v317_v31 }
  0x95   : > { %v325_v39 = vld [vmem:[%s4327_s30 + $0x160] sm:$0xff]  ;;  %v326_v41 = vld [vmem:[%s4327_s30 + $0x168] sm:$0xff]  ;;  %v3346_v43 = vcombine.low %v314_v32, %v318_v33 }
  0x96   : > { %v3353_v44 = vcombine.high %v321_v38, %v325_v39  ;;  %v3355_v45 = vcombine.high %v322_v40, %v326_v41  ;;  %v329_v46 = vld [vmem:[%s4327_s30 + $0x180] sm:$0xff]  ;;  %v330_v48 = vld [vmem:[%s4327_s30 + $0x188] sm:$0xff]  ;;  %v3352_v50 = vcombine.low %v321_v38, %v325_v39  ;;  %v3354_v51 = vcombine.low %v322_v40, %v326_v41 }
  0x97   : > { %1822 = vmatpush1.bf16.msra.mxu0 %v3328_v26  ;;  %1904 = vmatpush1.bf16.msra.mxu1 %v3330_v27  ;;  %v333_v47 = vld [vmem:[%s4327_s30 + $0x1a0] sm:$0xff]  ;;  %v334_v49 = vld [vmem:[%s4327_s30 + $0x1a8] sm:$0xff] }
  0x98   : > { %1823 = vmatprep.subr.bf16.mxu0 %v3337_v28  ;;  %1905 = vmatprep.subr.bf16.mxu1 %v3339_v29  ;;  %v3361_v52 = vcombine.high %v329_v46, %v333_v47  ;;  %v274_v53 = vld [vmem:[%s4320_s7 + $0x8] sm:$0xff]  ;;  %v3363_v54 = vcombine.high %v330_v48, %v334_v49  ;;  %v337_v55 = vld [vmem:[%s4327_s30 + $0x1c0] sm:$0xff]  ;;  %v3360_v60 = vcombine.low %v329_v46, %v333_v47 }
  0x99   : > { %v341_v56 = vld [vmem:[%s4327_s30 + $0x1e0] sm:$0xff]  ;;  %v4372_v57 = vpack.c.bf16 %v274_v53, %v274_v53  ;;  %v338_v58 = vld [vmem:[%s4327_s30 + $0x1c8] sm:$0xff]  ;;  %v3362_v61 = vcombine.low %v330_v48, %v334_v49 }
  0x9a   : > { %v342_v59 = vld [vmem:[%s4327_s30 + $0x1e8] sm:$0xff]  ;;  %v3369_v62 = vcombine.high %v337_v55, %v341_v56  ;;  %v345_v0 = vld [vmem:[%s4327_s30 + $0x200] sm:$0xff]  ;;  %v3368_v4 = vcombine.low %v337_v55, %v341_v56 }
  0x9b   : > { %1824 = vmatpush1.bf16.msra.mxu0 %v3336_v34  ;;  %1906 = vmatpush1.bf16.msra.mxu1 %v3338_v35  ;;  %v3371_v63 = vcombine.high %v338_v58, %v342_v59  ;;  %v349_v1 = vld [vmem:[%s4327_s30 + $0x220] sm:$0xff]  ;;  %v346_v2 = vld [vmem:[%s4327_s30 + $0x208] sm:$0xff]  ;;  %v3370_v5 = vcombine.low %v338_v58, %v342_v59 }
  0x9c   : > { %1825 = vmatprep.subr.bf16.mxu0 %v3345_v36  ;;  %1907 = vmatprep.subr.bf16.mxu1 %v3347_v37  ;;  %v350_v3 = vld [vmem:[%s4327_s30 + $0x228] sm:$0xff]  ;;  %v3377_v6 = vcombine.high %v345_v0, %v349_v1  ;;  %v353_v8 = vld [vmem:[%s4327_s30 + $0x240] sm:$0xff]  ;;  %v3376_v12 = vcombine.low %v345_v0, %v349_v1 }
  0x9d   : > { %1849 = vmatprep.mubr.bf16.mxu0 %v4372_v57  ;;  %1931 = vmatprep.mubr.bf16.mxu1 %v4372_v57  ;;  %v3379_v7 = vcombine.high %v346_v2, %v350_v3  ;;  %v357_v9 = vld [vmem:[%s4327_s30 + $0x260] sm:$0xff]  ;;  %v354_v10 = vld [vmem:[%s4327_s30 + $0x248] sm:$0xff]  ;;  %v3378_v13 = vcombine.low %v346_v2, %v350_v3 }
  0x9e   : > { %v358_v11 = vld [vmem:[%s4327_s30 + $0x268] sm:$0xff]  ;;  %v3385_v14 = vcombine.high %v353_v8, %v357_v9  ;;  %v361_v16 = vld [vmem:[%s4327_s30 + $0x280] sm:$0xff]  ;;  %v3384_v20 = vcombine.low %v353_v8, %v357_v9 }
  0x9f   : > { %1826 = vmatpush1.bf16.msra.mxu0 %v3344_v42  ;;  %1908 = vmatpush1.bf16.msra.mxu1 %v3346_v43  ;;  %v3387_v15 = vcombine.high %v354_v10, %v358_v11  ;;  %v365_v17 = vld [vmem:[%s4327_s30 + $0x2a0] sm:$0xff]  ;;  %v362_v18 = vld [vmem:[%s4327_s30 + $0x288] sm:$0xff]  ;;  %v3386_v21 = vcombine.low %v354_v10, %v358_v11 }
  0xa0   : > { %1827 = vmatprep.subr.bf16.mxu0 %v3353_v44  ;;  %1909 = vmatprep.subr.bf16.mxu1 %v3355_v45  ;;  %v366_v19 = vld [vmem:[%s4327_s30 + $0x2a8] sm:$0xff]  ;;  %v3393_v22 = vcombine.high %v361_v16, %v365_v17  ;;  %v369_v24 = vld [vmem:[%s4327_s30 + $0x2c0] sm:$0xff]  ;;  %v3392_v28 = vcombine.low %v361_v16, %v365_v17 }
  0xa1   : > { %v3395_v23 = vcombine.high %v362_v18, %v366_v19  ;;  %v373_v25 = vld [vmem:[%s4327_s30 + $0x2e0] sm:$0xff]  ;;  %v370_v26 = vld [vmem:[%s4327_s30 + $0x2c8] sm:$0xff]  ;;  %v3394_v29 = vcombine.low %v362_v18, %v366_v19 }
  0xa2   : > { %v374_v27 = vld [vmem:[%s4327_s30 + $0x2e8] sm:$0xff]  ;;  %v3401_v30 = vcombine.high %v369_v24, %v373_v25  ;;  %v377_v32 = vld [vmem:[%s4327_s30 + $0x300] sm:$0xff]  ;;  %v3400_v36 = vcombine.low %v369_v24, %v373_v25 }
  0xa3   : > { %1828 = vmatpush1.bf16.msra.mxu0 %v3352_v50  ;;  %1910 = vmatpush1.bf16.msra.mxu1 %v3354_v51  ;;  %v3403_v31 = vcombine.high %v370_v26, %v374_v27  ;;  %v381_v33 = vld [vmem:[%s4327_s30 + $0x320] sm:$0xff]  ;;  %v378_v34 = vld [vmem:[%s4327_s30 + $0x308] sm:$0xff]  ;;  %v3402_v37 = vcombine.low %v370_v26, %v374_v27 }
  0xa4   : > { %1829 = vmatprep.subr.bf16.mxu0 %v3361_v52  ;;  %1911 = vmatprep.subr.bf16.mxu1 %v3363_v54  ;;  %v382_v35 = vld [vmem:[%s4327_s30 + $0x328] sm:$0xff]  ;;  %v3409_v38 = vcombine.high %v377_v32, %v381_v33  ;;  %v385_v40 = vld [vmem:[%s4327_s30 + $0x340] sm:$0xff]  ;;  %v3408_v44 = vcombine.low %v377_v32, %v381_v33 }
  0xa5   : > { %v3411_v39 = vcombine.high %v378_v34, %v382_v35  ;;  %v389_v41 = vld [vmem:[%s4327_s30 + $0x360] sm:$0xff]  ;;  %v386_v42 = vld [vmem:[%s4327_s30 + $0x348] sm:$0xff]  ;;  %v3410_v45 = vcombine.low %v378_v34, %v382_v35 }
  0xa6   : > { %v390_v43 = vld [vmem:[%s4327_s30 + $0x368] sm:$0xff]  ;;  %v3417_v46 = vcombine.high %v385_v40, %v389_v41  ;;  %v393_v48 = vld [vmem:[%s4327_s30 + $0x380] sm:$0xff]  ;;  %v3416_v52 = vcombine.low %v385_v40, %v389_v41 }
  0xa7   : > { %1830 = vmatpush1.bf16.msra.mxu0 %v3360_v60  ;;  %1912 = vmatpush1.bf16.msra.mxu1 %v3362_v61  ;;  %v3419_v47 = vcombine.high %v386_v42, %v390_v43  ;;  %v397_v49 = vld [vmem:[%s4327_s30 + $0x3a0] sm:$0xff]  ;;  %v394_v50 = vld [vmem:[%s4327_s30 + $0x388] sm:$0xff]  ;;  %v3418_v53 = vcombine.low %v386_v42, %v390_v43 }
  0xa8   : > { %1831 = vmatprep.subr.bf16.mxu0 %v3369_v62  ;;  %1913 = vmatprep.subr.bf16.mxu1 %v3371_v63  ;;  %v398_v51 = vld [vmem:[%s4327_s30 + $0x3a8] sm:$0xff]  ;;  %v3425_v54 = vcombine.high %v393_v48, %v397_v49  ;;  %v401_v56 = vld [vmem:[%s4327_s30 + $0x3c0] sm:$0xff]  ;;  %v3424_v61 = vcombine.low %v393_v48, %v397_v49 }
  0xa9   : > { %v3427_v55 = vcombine.high %v394_v50, %v398_v51  ;;  %v405_v58 = vld [vmem:[%s4327_s30 + $0x3e0] sm:$0xff]  ;;  %v402_v59 = vld [vmem:[%s4327_s30 + $0x3c8] sm:$0xff]  ;;  %v3426_v62 = vcombine.low %v394_v50, %v398_v51 }
  0xaa   : > { %v406_v60 = vld [vmem:[%s4327_s30 + $0x3e8] sm:$0xff]  ;;  %v3433_v63 = vcombine.high %v401_v56, %v405_v58  ;;  %v409_v1 = vld [vmem:[%s4327_s30 + $0x400] sm:$0xff] }
  0xab   : > { %1832 = vmatpush1.bf16.msra.mxu0 %v3368_v4  ;;  %1914 = vmatpush1.bf16.msra.mxu1 %v3370_v5  ;;  %v3435_v0 = vcombine.high %v402_v59, %v406_v60  ;;  %v413_v2 = vld [vmem:[%s4327_s30 + $0x420] sm:$0xff]  ;;  %v410_v3 = vld [vmem:[%s4327_s30 + $0x408] sm:$0xff]  ;;  %v3432_v5 = vcombine.low %v401_v56, %v405_v58 }
  0xac   : > { %1833 = vmatprep.subr.bf16.mxu0 %v3377_v6  ;;  %1915 = vmatprep.subr.bf16.mxu1 %v3379_v7  ;;  %v414_v4 = vld [vmem:[%s4327_s30 + $0x428] sm:$0xff]  ;;  %v273_v6 = vld [vmem:[%s4320_s7] sm:$0xff]  ;;  %v3434_v7 = vcombine.low %v402_v59, %v406_v60  ;;  %v3441_v8 = vcombine.high %v409_v1, %v413_v2  ;;  %v3440_v16 = vcombine.low %v409_v1, %v413_v2 }
  0xad   : > { %v3443_v9 = vcombine.high %v410_v3, %v414_v4  ;;  %v417_v10 = vld [vmem:[%s4327_s30 + $0x440] sm:$0xff]  ;;  %v3442_v17 = vcombine.low %v410_v3, %v414_v4  ;;  %v430_v24 = vld [vmem:[%s4327_s30 + $0x4a8] sm:$0xff] }
  0xae   : > { %v421_v11 = vld [vmem:[%s4327_s30 + $0x460] sm:$0xff]  ;;  %v438_v32 = vld [vmem:[%s4327_s30 + $0x4e8] sm:$0xff] }
  0xaf   : > { %1834 = vmatpush1.bf16.msra.mxu0 %v3376_v12  ;;  %1916 = vmatpush1.bf16.msra.mxu1 %v3378_v13  ;;  %v4417_v12 = vpack.c.bf16 %v273_v6, %v273_v6  ;;  %v418_v13 = vld [vmem:[%s4327_s30 + $0x448] sm:$0xff]  ;;  %v3449_v18 = vcombine.high %v417_v10, %v421_v11  ;;  %v3448_v25 = vcombine.low %v417_v10, %v421_v11  ;;  %v473_v6 = vld [vmem:[%s4327_s30 + $0x600] sm:$0xff] }
  0xb0   : > { %1835 = vmatprep.subr.bf16.mxu0 %v3385_v14  ;;  %1917 = vmatprep.subr.bf16.mxu1 %v3387_v15  ;;  %v422_v14 = vld [vmem:[%s4327_s30 + $0x468] sm:$0xff]  ;;  %v276_v15 = vld [vmem:[%s4320_s7 + $0x18] sm:$0xff] }
  0xb1   : > { %v3451_v19 = vcombine.high %v418_v13, %v422_v14  ;;  %v3450_v26 = vcombine.low %v418_v13, %v422_v14  ;;  %v446_v40 = vld [vmem:[%s4327_s30 + $0x528] sm:$0xff] }
  0xb2   : > { %v454_v48 = vld [vmem:[%s4327_s30 + $0x568] sm:$0xff] }
  0xb3   : > { %1836 = vmatpush1.bf16.msra.mxu0 %v3384_v20  ;;  %1918 = vmatpush1.bf16.msra.mxu1 %v3386_v21  ;;  %v425_v20 = vld [vmem:[%s4327_s30 + $0x480] sm:$0xff]  ;;  %v462_v56 = vld [vmem:[%s4327_s30 + $0x5a8] sm:$0xff] }
  0xb4   : > { %1837 = vmatprep.subr.bf16.mxu0 %v3393_v22  ;;  %1919 = vmatprep.subr.bf16.mxu1 %v3395_v23  ;;  %v429_v21 = vld [vmem:[%s4327_s30 + $0x4a0] sm:$0xff]  ;;  %v4424_v22 = vpack.c.bf16 %v276_v15, %v276_v15  ;;  %v426_v23 = vld [vmem:[%s4327_s30 + $0x488] sm:$0xff] }
  0xb5   : > { %v3457_v27 = vcombine.high %v425_v20, %v429_v21  ;;  %v3456_v33 = vcombine.low %v425_v20, %v429_v21  ;;  %v3458_v34 = vcombine.low %v426_v23, %v430_v24  ;;  %v470_v1 = vld [vmem:[%s4327_s30 + $0x5e8] sm:$0xff]  ;;  %v481_v15 = vld [vmem:[%s4327_s30 + $0x640] sm:$0xff] }
  0xb7   : > { %1838 = vmatpush1.bf16.msra.mxu0 %v3392_v28  ;;  %1920 = vmatpush1.bf16.msra.mxu1 %v3394_v29  ;;  %v3459_v28 = vcombine.high %v426_v23, %v430_v24  ;;  %v433_v29 = vld [vmem:[%s4327_s30 + $0x4c0] sm:$0xff] }
  0xb8   : > { %1839 = vmatprep.subr.bf16.mxu0 %v3401_v30  ;;  %1921 = vmatprep.subr.bf16.mxu1 %v3403_v31  ;;  %v437_v30 = vld [vmem:[%s4327_s30 + $0x4e0] sm:$0xff]  ;;  %v434_v31 = vld [vmem:[%s4327_s30 + $0x4c8] sm:$0xff] }
  0xb9   : > { %v3465_v35 = vcombine.high %v433_v29, %v437_v30  ;;  %v3464_v41 = vcombine.low %v433_v29, %v437_v30  ;;  %v3466_v42 = vcombine.low %v434_v31, %v438_v32  ;;  %v489_v24 = vld [vmem:[%s4327_s30 + $0x680] sm:$0xff] }
  0xbb   : > { %1840 = vmatpush1.bf16.msra.mxu0 %v3400_v36  ;;  %1922 = vmatpush1.bf16.msra.mxu1 %v3402_v37  ;;  %v3467_v36 = vcombine.high %v434_v31, %v438_v32  ;;  %v441_v37 = vld [vmem:[%s4327_s30 + $0x500] sm:$0xff] }
  0xbc   : > { %1841 = vmatprep.subr.bf16.mxu0 %v3409_v38  ;;  %1923 = vmatprep.subr.bf16.mxu1 %v3411_v39  ;;  %v445_v38 = vld [vmem:[%s4327_s30 + $0x520] sm:$0xff]  ;;  %v442_v39 = vld [vmem:[%s4327_s30 + $0x508] sm:$0xff] }
  0xbd   : > { %v3473_v43 = vcombine.high %v441_v37, %v445_v38  ;;  %v3472_v49 = vcombine.low %v441_v37, %v445_v38  ;;  %v3474_v50 = vcombine.low %v442_v39, %v446_v40  ;;  %v497_v32 = vld [vmem:[%s4327_s30 + $0x6c0] sm:$0xff] }
  0xbf   : > { %1842 = vmatpush1.bf16.msra.mxu0 %v3408_v44  ;;  %1924 = vmatpush1.bf16.msra.mxu1 %v3410_v45  ;;  %v3475_v44 = vcombine.high %v442_v39, %v446_v40  ;;  %v449_v45 = vld [vmem:[%s4327_s30 + $0x540] sm:$0xff] }
  0xc0   : > { %1843 = vmatprep.subr.bf16.mxu0 %v3417_v46  ;;  %1925 = vmatprep.subr.bf16.mxu1 %v3419_v47  ;;  %v453_v46 = vld [vmem:[%s4327_s30 + $0x560] sm:$0xff]  ;;  %v450_v47 = vld [vmem:[%s4327_s30 + $0x548] sm:$0xff] }
  0xc1   : > { %v3481_v51 = vcombine.high %v449_v45, %v453_v46  ;;  %v3480_v58 = vcombine.low %v449_v45, %v453_v46  ;;  %v3482_v59 = vcombine.low %v450_v47, %v454_v48  ;;  %v505_v40 = vld [vmem:[%s4327_s30 + $0x700] sm:$0xff] }
  0xc3   : > { %1844 = vmatpush1.bf16.msra.mxu0 %v3416_v52  ;;  %1926 = vmatpush1.bf16.msra.mxu1 %v3418_v53  ;;  %v3483_v52 = vcombine.high %v450_v47, %v454_v48  ;;  %v457_v53 = vld [vmem:[%s4327_s30 + $0x580] sm:$0xff] }
  0xc4   : > { %1845 = vmatprep.subr.bf16.mxu0 %v3425_v54  ;;  %1927 = vmatprep.subr.bf16.mxu1 %v3427_v55  ;;  %v461_v54 = vld [vmem:[%s4327_s30 + $0x5a0] sm:$0xff]  ;;  %v458_v55 = vld [vmem:[%s4327_s30 + $0x588] sm:$0xff] }
  0xc5   : > { %v3489_v60 = vcombine.high %v457_v53, %v461_v54  ;;  %v3488_v2 = vcombine.low %v457_v53, %v461_v54  ;;  %v3490_v3 = vcombine.low %v458_v55, %v462_v56  ;;  %v513_v48 = vld [vmem:[%s4327_s30 + $0x740] sm:$0xff] }
  0xc7   : > { %1846 = vmatpush1.bf16.msra.mxu0 %v3424_v61  ;;  %1928 = vmatpush1.bf16.msra.mxu1 %v3426_v62  ;;  %v3491_v61 = vcombine.high %v458_v55, %v462_v56  ;;  %v465_v62 = vld [vmem:[%s4327_s30 + $0x5c0] sm:$0xff] }
  0xc8   : > { %1847 = vmatprep.subr.bf16.mxu0 %v3433_v63  ;;  %1929 = vmatprep.subr.bf16.mxu1 %v3435_v0  ;;  %v469_v63 = vld [vmem:[%s4327_s30 + $0x5e0] sm:$0xff]  ;;  %v466_v0 = vld [vmem:[%s4327_s30 + $0x5c8] sm:$0xff] }
  0xc9   : > { %v3497_v4 = vcombine.high %v465_v62, %v469_v63  ;;  %v3496_v10 = vcombine.low %v465_v62, %v469_v63  ;;  %v3498_v11 = vcombine.low %v466_v0, %v470_v1  ;;  %v521_v56 = vld [vmem:[%s4327_s30 + $0x780] sm:$0xff] }
  0xcb   : > { %1848 = vmatpush1.bf16.msra.mxu0 %v3432_v5  ;;  %1930 = vmatpush1.bf16.msra.mxu1 %v3434_v7  ;;  %v3499_v5 = vcombine.high %v466_v0, %v470_v1  ;;  %v477_v7 = vld [vmem:[%s4327_s30 + $0x620] sm:$0xff] }
  0xcc   : > { %1858 = vmatprep.subr.bf16.mxu0 %v3441_v8  ;;  %1940 = vmatprep.subr.bf16.mxu1 %v3443_v9  ;;  %v474_v8 = vld [vmem:[%s4327_s30 + $0x608] sm:$0xff]  ;;  %v3505_v13 = vcombine.high %v473_v6, %v477_v7  ;;  %v529_v1 = vld [vmem:[%s4327_s30 + $0x7c0] sm:$0xff] }
  0xcd   : > { %v478_v9 = vld [vmem:[%s4327_s30 + $0x628] sm:$0xff] }
  0xce   : > { %1850 = vmatmul.mubr.bf16.vlgmr.msra.gmra.mrb[0].mxu0 %v4417_v12  ;;  %1932 = vmatmul.mubr.bf16.vlgmr.msra.gmra.mrb[0].mxu1 %v4417_v12  ;;  %v3507_v14 = vcombine.high %v474_v8, %v478_v9  ;;  %v3506_v20 = vcombine.low %v474_v8, %v478_v9  ;;  %v283_v9 = vld [vmem:[%s4327_s30 + $0x10] sm:$0xff] }
  0xcf   : > { %1859 = vmatpush1.bf16.msra.mxu0 %v3440_v16  ;;  %1941 = vmatpush1.bf16.msra.mxu1 %v3442_v17  ;;  %v485_v16 = vld [vmem:[%s4327_s30 + $0x660] sm:$0xff]  ;;  %v482_v17 = vld [vmem:[%s4327_s30 + $0x648] sm:$0xff] }
  0xd0   : > { %1860 = vmatprep.subr.bf16.mxu0 %v3449_v18  ;;  %1942 = vmatprep.subr.bf16.mxu1 %v3451_v19  ;;  %v486_v18 = vld [vmem:[%s4327_s30 + $0x668] sm:$0xff]  ;;  %v3504_v19 = vcombine.low %v473_v6, %v477_v7  ;;  %v3513_v21 = vcombine.high %v481_v15, %v485_v16 }
  0xd1   : > { %1890 = vmatprep.mubr.bf16.mxu0 %v4424_v22  ;;  %1972 = vmatprep.mubr.bf16.mxu1 %v4424_v22  ;;  %v3515_v23 = vcombine.high %v482_v17, %v486_v18  ;;  %v3514_v29 = vcombine.low %v482_v17, %v486_v18 }
  0xd3   : > { %1861 = vmatpush1.bf16.msra.mxu0 %v3448_v25  ;;  %1943 = vmatpush1.bf16.msra.mxu1 %v3450_v26  ;;  %v493_v25 = vld [vmem:[%s4327_s30 + $0x6a0] sm:$0xff]  ;;  %v490_v26 = vld [vmem:[%s4327_s30 + $0x688] sm:$0xff] }
  0xd4   : > { %1862 = vmatprep.subr.bf16.mxu0 %v3457_v27  ;;  %1944 = vmatprep.subr.bf16.mxu1 %v3459_v28  ;;  %v494_v27 = vld [vmem:[%s4327_s30 + $0x6a8] sm:$0xff]  ;;  %v3512_v28 = vcombine.low %v481_v15, %v485_v16  ;;  %v3521_v30 = vcombine.high %v489_v24, %v493_v25  ;;  %v275_v15 = vld [vmem:[%s4320_s7 + $0x10] sm:$0xff] }
  0xd5   : > { %v3523_v31 = vcombine.high %v490_v26, %v494_v27  ;;  %v3522_v37 = vcombine.low %v490_v26, %v494_v27 }
  0xd7   : > { %1863 = vmatpush1.bf16.msra.mxu0 %v3456_v33  ;;  %1945 = vmatpush1.bf16.msra.mxu1 %v3458_v34  ;;  %v501_v33 = vld [vmem:[%s4327_s30 + $0x6e0] sm:$0xff]  ;;  %v498_v34 = vld [vmem:[%s4327_s30 + $0x6c8] sm:$0xff] }
  0xd8   : > { %1864 = vmatprep.subr.bf16.mxu0 %v3465_v35  ;;  %1946 = vmatprep.subr.bf16.mxu1 %v3467_v36  ;;  %v502_v35 = vld [vmem:[%s4327_s30 + $0x6e8] sm:$0xff]  ;;  %v3520_v36 = vcombine.low %v489_v24, %v493_v25  ;;  %v3529_v38 = vcombine.high %v497_v32, %v501_v33  ;;  %v296_v24 = vld [vmem:[%s4327_s30 + $0x78] sm:$0xff] }
  0xd9   : > { %v3531_v39 = vcombine.high %v498_v34, %v502_v35  ;;  %v3530_v45 = vcombine.low %v498_v34, %v502_v35 }
  0xdb   : > { %1865 = vmatpush1.bf16.msra.mxu0 %v3464_v41  ;;  %1947 = vmatpush1.bf16.msra.mxu1 %v3466_v42  ;;  %v509_v41 = vld [vmem:[%s4327_s30 + $0x720] sm:$0xff]  ;;  %v506_v42 = vld [vmem:[%s4327_s30 + $0x708] sm:$0xff] }
  0xdc   : > { %1866 = vmatprep.subr.bf16.mxu0 %v3473_v43  ;;  %1948 = vmatprep.subr.bf16.mxu1 %v3475_v44  ;;  %v510_v43 = vld [vmem:[%s4327_s30 + $0x728] sm:$0xff]  ;;  %v3528_v44 = vcombine.low %v497_v32, %v501_v33  ;;  %v3537_v46 = vcombine.high %v505_v40, %v509_v41  ;;  %v304_v32 = vld [vmem:[%s4327_s30 + $0xb8] sm:$0xff] }
  0xdd   : > { %v3539_v47 = vcombine.high %v506_v42, %v510_v43  ;;  %v3538_v53 = vcombine.low %v506_v42, %v510_v43 }
  0xdf   : > { %1867 = vmatpush1.bf16.msra.mxu0 %v3472_v49  ;;  %1949 = vmatpush1.bf16.msra.mxu1 %v3474_v50  ;;  %v517_v49 = vld [vmem:[%s4327_s30 + $0x760] sm:$0xff]  ;;  %v514_v50 = vld [vmem:[%s4327_s30 + $0x748] sm:$0xff] }
  0xe0   : > { %1868 = vmatprep.subr.bf16.mxu0 %v3481_v51  ;;  %1950 = vmatprep.subr.bf16.mxu1 %v3483_v52  ;;  %v518_v51 = vld [vmem:[%s4327_s30 + $0x768] sm:$0xff]  ;;  %v3536_v52 = vcombine.low %v505_v40, %v509_v41  ;;  %v3545_v54 = vcombine.high %v513_v48, %v517_v49  ;;  %v312_v40 = vld [vmem:[%s4327_s30 + $0xf8] sm:$0xff] }
  0xe1   : > { %v3547_v55 = vcombine.high %v514_v50, %v518_v51  ;;  %v3546_v62 = vcombine.low %v514_v50, %v518_v51 }
  0xe3   : > { %1869 = vmatpush1.bf16.msra.mxu0 %v3480_v58  ;;  %1951 = vmatpush1.bf16.msra.mxu1 %v3482_v59  ;;  %v525_v58 = vld [vmem:[%s4327_s30 + $0x7a0] sm:$0xff]  ;;  %v522_v59 = vld [vmem:[%s4327_s30 + $0x788] sm:$0xff] }
  0xe4   : > { %1870 = vmatprep.subr.bf16.mxu0 %v3489_v60  ;;  %1952 = vmatprep.subr.bf16.mxu1 %v3491_v61  ;;  %v526_v60 = vld [vmem:[%s4327_s30 + $0x7a8] sm:$0xff]  ;;  %v3544_v61 = vcombine.low %v513_v48, %v517_v49  ;;  %v3553_v63 = vcombine.high %v521_v56, %v525_v58  ;;  %v320_v48 = vld [vmem:[%s4327_s30 + $0x138] sm:$0xff] }
  0xe5   : > { %v3555_v0 = vcombine.high %v522_v59, %v526_v60  ;;  %v3554_v6 = vcombine.low %v522_v59, %v526_v60 }
  0xe7   : > { %1871 = vmatpush1.bf16.msra.mxu0 %v3488_v2  ;;  %1953 = vmatpush1.bf16.msra.mxu1 %v3490_v3  ;;  %v533_v2 = vld [vmem:[%s4327_s30 + $0x7e0] sm:$0xff]  ;;  %v530_v3 = vld [vmem:[%s4327_s30 + $0x7c8] sm:$0xff] }
  0xe8   : > { %1872 = vmatprep.subr.bf16.mxu0 %v3497_v4  ;;  %1954 = vmatprep.subr.bf16.mxu1 %v3499_v5  ;;  %v534_v4 = vld [vmem:[%s4327_s30 + $0x7e8] sm:$0xff]  ;;  %v3552_v5 = vcombine.low %v521_v56, %v525_v58  ;;  %v3561_v7 = vcombine.high %v529_v1, %v533_v2 }
  0xe9   : > { %v3563_v8 = vcombine.high %v530_v3, %v534_v4  ;;  %v3562_v16 = vcombine.low %v530_v3, %v534_v4 }
  0xeb   : > { %1873 = vmatpush1.bf16.msra.mxu0 %v3496_v10  ;;  %1955 = vmatpush1.bf16.msra.mxu1 %v3498_v11  ;;  %v287_v10 = vld [vmem:[%s4327_s30 + $0x30] sm:$0xff]  ;;  %v284_v11 = vld [vmem:[%s4327_s30 + $0x18] sm:$0xff] }
  0xec   : > { %1874 = vmatprep.subr.bf16.mxu0 %v3505_v13  ;;  %1956 = vmatprep.subr.bf16.mxu1 %v3507_v14  ;;  %v288_v13 = vld [vmem:[%s4327_s30 + $0x38] sm:$0xff]  ;;  %v3560_v14 = vcombine.low %v529_v1, %v533_v2  ;;  %v3317_v17 = vcombine.high %v283_v9, %v287_v10  ;;  %v3316_v25 = vcombine.low %v283_v9, %v287_v10 }
  0xed   : > { %v3319_v18 = vcombine.high %v284_v11, %v288_v13  ;;  %v3318_v26 = vcombine.low %v284_v11, %v288_v13 }
  0xef   : > { %1875 = vmatpush1.bf16.msra.mxu0 %v3504_v19  ;;  %1957 = vmatpush1.bf16.msra.mxu1 %v3506_v20  ;;  %v291_v19 = vld [vmem:[%s4327_s30 + $0x50] sm:$0xff] }
  0xf0   : > { %1876 = vmatprep.subr.bf16.mxu0 %v3513_v21  ;;  %1958 = vmatprep.subr.bf16.mxu1 %v3515_v23  ;;  %v295_v20 = vld [vmem:[%s4327_s30 + $0x70] sm:$0xff]  ;;  %v4491_v21 = vpack.c.bf16 %v275_v15, %v275_v15  ;;  %v292_v23 = vld [vmem:[%s4327_s30 + $0x58] sm:$0xff] }
  0xf1   : > { %v3325_v27 = vcombine.high %v291_v19, %v295_v20  ;;  %v3324_v33 = vcombine.low %v291_v19, %v295_v20  ;;  %v3326_v34 = vcombine.low %v292_v23, %v296_v24  ;;  %v351_v15 = vld [vmem:[%s4327_s30 + $0x230] sm:$0xff] }
  0xf3   : > { %1877 = vmatpush1.bf16.msra.mxu0 %v3512_v28  ;;  %1959 = vmatpush1.bf16.msra.mxu1 %v3514_v29  ;;  %v3327_v28 = vcombine.high %v292_v23, %v296_v24  ;;  %v299_v29 = vld [vmem:[%s4327_s30 + $0x90] sm:$0xff] }
  0xf4   : > { %1878 = vmatprep.subr.bf16.mxu0 %v3521_v30  ;;  %1960 = vmatprep.subr.bf16.mxu1 %v3523_v31  ;;  %v303_v30 = vld [vmem:[%s4327_s30 + $0xb0] sm:$0xff]  ;;  %v300_v31 = vld [vmem:[%s4327_s30 + $0x98] sm:$0xff] }
  0xf5   : > { %v3333_v35 = vcombine.high %v299_v29, %v303_v30  ;;  %v3332_v41 = vcombine.low %v299_v29, %v303_v30  ;;  %v3334_v42 = vcombine.low %v300_v31, %v304_v32  ;;  %v355_v24 = vld [vmem:[%s4327_s30 + $0x250] sm:$0xff] }
  0xf7   : > { %1879 = vmatpush1.bf16.msra.mxu0 %v3520_v36  ;;  %1961 = vmatpush1.bf16.msra.mxu1 %v3522_v37  ;;  %v3335_v36 = vcombine.high %v300_v31, %v304_v32  ;;  %v307_v37 = vld [vmem:[%s4327_s30 + $0xd0] sm:$0xff] }
  0xf8   : > { %1880 = vmatprep.subr.bf16.mxu0 %v3529_v38  ;;  %1962 = vmatprep.subr.bf16.mxu1 %v3531_v39  ;;  %v311_v38 = vld [vmem:[%s4327_s30 + $0xf0] sm:$0xff]  ;;  %v308_v39 = vld [vmem:[%s4327_s30 + $0xd8] sm:$0xff] }
  0xf9   : > { %v3341_v43 = vcombine.high %v307_v37, %v311_v38  ;;  %v3340_v49 = vcombine.low %v307_v37, %v311_v38  ;;  %v363_v32 = vld [vmem:[%s4327_s30 + $0x290] sm:$0xff] }
  0xfb   : > { %1881 = vmatpush1.bf16.msra.mxu0 %v3528_v44  ;;  %1963 = vmatpush1.bf16.msra.mxu1 %v3530_v45  ;;  %v3343_v44 = vcombine.high %v308_v39, %v312_v40  ;;  %v315_v45 = vld [vmem:[%s4327_s30 + $0x110] sm:$0xff] }
  0xfc   : > { %1882 = vmatprep.subr.bf16.mxu0 %v3537_v46  ;;  %1964 = vmatprep.subr.bf16.mxu1 %v3539_v47  ;;  %v319_v46 = vld [vmem:[%s4327_s30 + $0x130] sm:$0xff]  ;;  %v316_v47 = vld [vmem:[%s4327_s30 + $0x118] sm:$0xff] }
  0xfd   : > { %v3349_v50 = vcombine.high %v315_v45, %v319_v46  ;;  %v3351_v51 = vcombine.high %v316_v47, %v320_v48  ;;  %v3348_v56 = vcombine.low %v315_v45, %v319_v46  ;;  %v3350_v58 = vcombine.low %v316_v47, %v320_v48  ;;  %v379_v48 = vld [vmem:[%s4327_s30 + $0x310] sm:$0xff] }
  0xff   : > { %1883 = vmatpush1.bf16.msra.mxu0 %v3536_v52  ;;  %1965 = vmatpush1.bf16.msra.mxu1 %v3538_v53  ;;  %v323_v52 = vld [vmem:[%s4327_s30 + $0x150] sm:$0xff] }
 0x100   : > { %1884 = vmatprep.subr.bf16.mxu0 %v3545_v54  ;;  %1966 = vmatprep.subr.bf16.mxu1 %v3547_v55  ;;  %v327_v53 = vld [vmem:[%s4327_s30 + $0x170] sm:$0xff]  ;;  %v324_v54 = vld [vmem:[%s4327_s30 + $0x158] sm:$0xff] }
 0x101   : > { %v328_v55 = vld [vmem:[%s4327_s30 + $0x178] sm:$0xff]  ;;  %v3357_v59 = vcombine.high %v323_v52, %v327_v53  ;;  %v3356_v1 = vcombine.low %v323_v52, %v327_v53 }
 0x102   : > { %v3359_v60 = vcombine.high %v324_v54, %v328_v55  ;;  %v3358_v2 = vcombine.low %v324_v54, %v328_v55  ;;  %v387_v55 = vld [vmem:[%s4327_s30 + $0x350] sm:$0xff] }
 0x103   : > { %1885 = vmatpush1.bf16.msra.mxu0 %v3544_v61  ;;  %1967 = vmatpush1.bf16.msra.mxu1 %v3546_v62  ;;  %v331_v61 = vld [vmem:[%s4327_s30 + $0x190] sm:$0xff] }
 0x104   : > { %1886 = vmatprep.subr.bf16.mxu0 %v3553_v63  ;;  %1968 = vmatprep.subr.bf16.mxu1 %v3555_v0  ;;  %v335_v62 = vld [vmem:[%s4327_s30 + $0x1b0] sm:$0xff]  ;;  %v332_v63 = vld [vmem:[%s4327_s30 + $0x198] sm:$0xff] }
 0x105   : > { %v336_v0 = vld [vmem:[%s4327_s30 + $0x1b8] sm:$0xff]  ;;  %v3365_v3 = vcombine.high %v331_v61, %v335_v62  ;;  %v3364_v9 = vcombine.low %v331_v61, %v335_v62 }
 0x106   : > { %v3367_v4 = vcombine.high %v332_v63, %v336_v0  ;;  %v3366_v10 = vcombine.low %v332_v63, %v336_v0  ;;  %v395_v0 = vld [vmem:[%s4327_s30 + $0x390] sm:$0xff] }
 0x107   : > { %1887 = vmatpush1.bf16.msra.mxu0 %v3552_v5  ;;  %1969 = vmatpush1.bf16.msra.mxu1 %v3554_v6  ;;  %v339_v5 = vld [vmem:[%s4327_s30 + $0x1d0] sm:$0xff] }
 0x108   : > { %1888 = vmatprep.subr.bf16.mxu0 %v3561_v7  ;;  %1970 = vmatprep.subr.bf16.mxu1 %v3563_v8  ;;  %v343_v6 = vld [vmem:[%s4327_s30 + $0x1f0] sm:$0xff]  ;;  %v340_v7 = vld [vmem:[%s4327_s30 + $0x1d8] sm:$0xff] }
 0x109   : > { %v344_v8 = vld [vmem:[%s4327_s30 + $0x1f8] sm:$0xff]  ;;  %v3373_v11 = vcombine.high %v339_v5, %v343_v6 }
 0x10a   : > { %v3375_v13 = vcombine.high %v340_v7, %v344_v8  ;;  %v3374_v19 = vcombine.low %v340_v7, %v344_v8  ;;  %v403_v8 = vld [vmem:[%s4327_s30 + $0x3d0] sm:$0xff] }
 0x10b   : > { %1889 = vmatpush1.bf16.msra.mxu0 %v3560_v14  ;;  %1971 = vmatpush1.bf16.msra.mxu1 %v3562_v16  ;;  %v347_v14 = vld [vmem:[%s4327_s30 + $0x210] sm:$0xff]  ;;  %v348_v16 = vld [vmem:[%s4327_s30 + $0x218] sm:$0xff] }
 0x10c   : > { %1981 = vmatprep.subr.bf16.mxu0 %v3317_v17  ;;  %2063 = vmatprep.subr.bf16.mxu1 %v3319_v18  ;;  %v352_v17 = vld [vmem:[%s4327_s30 + $0x238] sm:$0xff]  ;;  %v3372_v18 = vcombine.low %v339_v5, %v343_v6  ;;  %v3381_v20 = vcombine.high %v347_v14, %v351_v15 }
 0x10d   : > { %v3383_v23 = vcombine.high %v348_v16, %v352_v17  ;;  %v3382_v29 = vcombine.low %v348_v16, %v352_v17  ;;  %v411_v17 = vld [vmem:[%s4327_s30 + $0x410] sm:$0xff] }
 0x10e   : > { %1891 = vmatmul.mubr.bf16.vlgmr.msra.gmra.mrb[0].mxu0 %v4491_v21  ;;  %1973 = vmatmul.mubr.bf16.vlgmr.msra.gmra.mrb[0].mxu1 %v4491_v21 }
 0x10f   : > { %1982 = vmatpush1.bf16.msra.mxu0 %v3316_v25  ;;  %2064 = vmatpush1.bf16.msra.mxu1 %v3318_v26  ;;  %v359_v25 = vld [vmem:[%s4327_s30 + $0x270] sm:$0xff]  ;;  %v356_v26 = vld [vmem:[%s4327_s30 + $0x258] sm:$0xff] }
 0x110   : > { %1983 = vmatprep.subr.bf16.mxu0 %v3325_v27  ;;  %2065 = vmatprep.subr.bf16.mxu1 %v3327_v28  ;;  %v360_v27 = vld [vmem:[%s4327_s30 + $0x278] sm:$0xff]  ;;  %v3380_v28 = vcombine.low %v347_v14, %v351_v15  ;;  %v3389_v30 = vcombine.high %v355_v24, %v359_v25 }
 0x111   : > { %2013 = vmatprep.mubr.bf16.mxu0 %v4372_v57  ;;  %2095 = vmatprep.mubr.bf16.mxu1 %v4372_v57  ;;  %v3342_v57 = vcombine.low %v308_v39, %v312_v40  ;;  %v3391_v31 = vcombine.high %v356_v26, %v360_v27  ;;  %v3390_v37 = vcombine.low %v356_v26, %v360_v27  ;;  %v371_v40 = vld [vmem:[%s4327_s30 + $0x2d0] sm:$0xff] }
 0x112   : > { %v419_v27 = vld [vmem:[%s4327_s30 + $0x450] sm:$0xff] }
 0x113   : > { %1984 = vmatpush1.bf16.msra.mxu0 %v3324_v33  ;;  %2066 = vmatpush1.bf16.msra.mxu1 %v3326_v34  ;;  %v367_v33 = vld [vmem:[%s4327_s30 + $0x2b0] sm:$0xff]  ;;  %v364_v34 = vld [vmem:[%s4327_s30 + $0x298] sm:$0xff] }
 0x114   : > { %1985 = vmatprep.subr.bf16.mxu0 %v3333_v35  ;;  %2067 = vmatprep.subr.bf16.mxu1 %v3335_v36  ;;  %v368_v35 = vld [vmem:[%s4327_s30 + $0x2b8] sm:$0xff]  ;;  %v3388_v36 = vcombine.low %v355_v24, %v359_v25  ;;  %v3397_v38 = vcombine.high %v363_v32, %v367_v33 }
 0x115   : > { %v3399_v39 = vcombine.high %v364_v34, %v368_v35  ;;  %v3398_v45 = vcombine.low %v364_v34, %v368_v35  ;;  %v427_v35 = vld [vmem:[%s4327_s30 + $0x490] sm:$0xff] }
 0x117   : > { %1986 = vmatpush1.bf16.msra.mxu0 %v3332_v41  ;;  %2068 = vmatpush1.bf16.msra.mxu1 %v3334_v42  ;;  %v375_v41 = vld [vmem:[%s4327_s30 + $0x2f0] sm:$0xff]  ;;  %v372_v42 = vld [vmem:[%s4327_s30 + $0x2d8] sm:$0xff] }
 0x118   : > { %1987 = vmatprep.subr.bf16.mxu0 %v3341_v43  ;;  %2069 = vmatprep.subr.bf16.mxu1 %v3343_v44  ;;  %v376_v43 = vld [vmem:[%s4327_s30 + $0x2f8] sm:$0xff]  ;;  %v3396_v44 = vcombine.low %v363_v32, %v367_v33  ;;  %v3405_v46 = vcombine.high %v371_v40, %v375_v41 }
 0x119   : > { %v3407_v47 = vcombine.high %v372_v42, %v376_v43  ;;  %v3406_v52 = vcombine.low %v372_v42, %v376_v43  ;;  %v435_v43 = vld [vmem:[%s4327_s30 + $0x4d0] sm:$0xff] }
 0x11b   : > { %1988 = vmatpush1.bf16.msra.mxu0 %v3340_v49  ;;  %2070 = vmatpush1.bf16.msra.mxu1 %v3342_v57  ;;  %v383_v49 = vld [vmem:[%s4327_s30 + $0x330] sm:$0xff]  ;;  %v380_v57 = vld [vmem:[%s4327_s30 + $0x318] sm:$0xff] }
 0x11c   : > { %1989 = vmatprep.subr.bf16.mxu0 %v3349_v50  ;;  %2071 = vmatprep.subr.bf16.mxu1 %v3351_v51  ;;  %v384_v50 = vld [vmem:[%s4327_s30 + $0x338] sm:$0xff]  ;;  %v3404_v51 = vcombine.low %v371_v40, %v375_v41  ;;  %v3413_v53 = vcombine.high %v379_v48, %v383_v49 }
 0x11d   : > { %v3415_v54 = vcombine.high %v380_v57, %v384_v50  ;;  %v3414_v61 = vcombine.low %v380_v57, %v384_v50  ;;  %v443_v57 = vld [vmem:[%s4327_s30 + $0x510] sm:$0xff] }
 0x11e   : > { %v447_v50 = vld [vmem:[%s4327_s30 + $0x530] sm:$0xff] }
 0x11f   : > { %1990 = vmatpush1.bf16.msra.mxu0 %v3348_v56  ;;  %2072 = vmatpush1.bf16.msra.mxu1 %v3350_v58  ;;  %v391_v56 = vld [vmem:[%s4327_s30 + $0x370] sm:$0xff]  ;;  %v388_v58 = vld [vmem:[%s4327_s30 + $0x358] sm:$0xff] }
 0x120   : > { %1991 = vmatprep.subr.bf16.mxu0 %v3357_v59  ;;  %2073 = vmatprep.subr.bf16.mxu1 %v3359_v60  ;;  %v392_v59 = vld [vmem:[%s4327_s30 + $0x378] sm:$0xff]  ;;  %v3412_v60 = vcombine.low %v379_v48, %v383_v49  ;;  %v3421_v62 = vcombine.high %v387_v55, %v391_v56 }
 0x121   : > { %v3423_v63 = vcombine.high %v388_v58, %v392_v59  ;;  %v3422_v5 = vcombine.low %v388_v58, %v392_v59  ;;  %v455_v58 = vld [vmem:[%s4327_s30 + $0x570] sm:$0xff]  ;;  %v452_v59 = vld [vmem:[%s4327_s30 + $0x558] sm:$0xff] }
 0x123   : > { %1992 = vmatpush1.bf16.msra.mxu0 %v3356_v1  ;;  %2074 = vmatpush1.bf16.msra.mxu1 %v3358_v2  ;;  %v399_v1 = vld [vmem:[%s4327_s30 + $0x3b0] sm:$0xff]  ;;  %v396_v2 = vld [vmem:[%s4327_s30 + $0x398] sm:$0xff] }
 0x124   : > { %1993 = vmatprep.subr.bf16.mxu0 %v3365_v3  ;;  %2075 = vmatprep.subr.bf16.mxu1 %v3367_v4  ;;  %v400_v3 = vld [vmem:[%s4327_s30 + $0x3b8] sm:$0xff]  ;;  %v3420_v4 = vcombine.low %v387_v55, %v391_v56  ;;  %v3429_v6 = vcombine.high %v395_v0, %v399_v1  ;;  %v451_v56 = vld [vmem:[%s4327_s30 + $0x550] sm:$0xff] }
 0x125   : > { %v3431_v7 = vcombine.high %v396_v2, %v400_v3  ;;  %v3430_v14 = vcombine.low %v396_v2, %v400_v3  ;;  %v463_v2 = vld [vmem:[%s4327_s30 + $0x5b0] sm:$0xff]  ;;  %v460_v3 = vld [vmem:[%s4327_s30 + $0x598] sm:$0xff] }
 0x127   : > { %1994 = vmatpush1.bf16.msra.mxu0 %v3364_v9  ;;  %2076 = vmatpush1.bf16.msra.mxu1 %v3366_v10  ;;  %v407_v9 = vld [vmem:[%s4327_s30 + $0x3f0] sm:$0xff]  ;;  %v404_v10 = vld [vmem:[%s4327_s30 + $0x3d8] sm:$0xff] }
 0x128   : > { %1995 = vmatprep.subr.bf16.mxu0 %v3373_v11  ;;  %2077 = vmatprep.subr.bf16.mxu1 %v3375_v13  ;;  %v408_v11 = vld [vmem:[%s4327_s30 + $0x3f8] sm:$0xff]  ;;  %v3428_v13 = vcombine.low %v395_v0, %v399_v1  ;;  %v3437_v15 = vcombine.high %v403_v8, %v407_v9  ;;  %v459_v1 = vld [vmem:[%s4327_s30 + $0x590] sm:$0xff] }
 0x129   : > { %v3439_v16 = vcombine.high %v404_v10, %v408_v11  ;;  %v3438_v24 = vcombine.low %v404_v10, %v408_v11  ;;  %v471_v10 = vld [vmem:[%s4327_s30 + $0x5f0] sm:$0xff]  ;;  %v468_v11 = vld [vmem:[%s4327_s30 + $0x5d8] sm:$0xff] }
 0x12b   : > { %1996 = vmatpush1.bf16.msra.mxu0 %v3372_v18  ;;  %2078 = vmatpush1.bf16.msra.mxu1 %v3374_v19  ;;  %v415_v18 = vld [vmem:[%s4327_s30 + $0x430] sm:$0xff]  ;;  %v412_v19 = vld [vmem:[%s4327_s30 + $0x418] sm:$0xff] }
 0x12c   : > { %1997 = vmatprep.subr.bf16.mxu0 %v3381_v20  ;;  %2079 = vmatprep.subr.bf16.mxu1 %v3383_v23  ;;  %v416_v20 = vld [vmem:[%s4327_s30 + $0x438] sm:$0xff]  ;;  %v3436_v23 = vcombine.low %v403_v8, %v407_v9  ;;  %v3445_v25 = vcombine.high %v411_v17, %v415_v18  ;;  %v467_v9 = vld [vmem:[%s4327_s30 + $0x5d0] sm:$0xff] }
 0x12d   : > { %v3447_v26 = vcombine.high %v412_v19, %v416_v20  ;;  %v3446_v32 = vcombine.low %v412_v19, %v416_v20  ;;  %v479_v19 = vld [vmem:[%s4327_s30 + $0x630] sm:$0xff]  ;;  %v476_v20 = vld [vmem:[%s4327_s30 + $0x618] sm:$0xff] }
 0x12f   : > { %1998 = vmatpush1.bf16.msra.mxu0 %v3380_v28  ;;  %2080 = vmatpush1.bf16.msra.mxu1 %v3382_v29  ;;  %v423_v28 = vld [vmem:[%s4327_s30 + $0x470] sm:$0xff]  ;;  %v420_v29 = vld [vmem:[%s4327_s30 + $0x458] sm:$0xff] }
 0x130   : > { %1999 = vmatprep.subr.bf16.mxu0 %v3389_v30  ;;  %2081 = vmatprep.subr.bf16.mxu1 %v3391_v31  ;;  %v424_v30 = vld [vmem:[%s4327_s30 + $0x478] sm:$0xff]  ;;  %v3444_v31 = vcombine.low %v411_v17, %v415_v18  ;;  %v3453_v33 = vcombine.high %v419_v27, %v423_v28  ;;  %v475_v18 = vld [vmem:[%s4327_s30 + $0x610] sm:$0xff] }
 0x131   : > { %v3455_v34 = vcombine.high %v420_v29, %v424_v30  ;;  %v3454_v40 = vcombine.low %v420_v29, %v424_v30  ;;  %v487_v29 = vld [vmem:[%s4327_s30 + $0x670] sm:$0xff]  ;;  %v484_v30 = vld [vmem:[%s4327_s30 + $0x658] sm:$0xff] }
 0x133   : > { %2000 = vmatpush1.bf16.msra.mxu0 %v3388_v36  ;;  %2082 = vmatpush1.bf16.msra.mxu1 %v3390_v37  ;;  %v431_v36 = vld [vmem:[%s4327_s30 + $0x4b0] sm:$0xff]  ;;  %v428_v37 = vld [vmem:[%s4327_s30 + $0x498] sm:$0xff] }
 0x134   : > { %2001 = vmatprep.subr.bf16.mxu0 %v3397_v38  ;;  %2083 = vmatprep.subr.bf16.mxu1 %v3399_v39  ;;  %v432_v38 = vld [vmem:[%s4327_s30 + $0x4b8] sm:$0xff]  ;;  %v3452_v39 = vcombine.low %v419_v27, %v423_v28  ;;  %v3461_v41 = vcombine.high %v427_v35, %v431_v36  ;;  %v483_v28 = vld [vmem:[%s4327_s30 + $0x650] sm:$0xff] }
 0x135   : > { %v3463_v42 = vcombine.high %v428_v37, %v432_v38 }
 0x137   : > { %2002 = vmatpush1.bf16.msra.mxu0 %v3396_v44  ;;  %2084 = vmatpush1.bf16.msra.mxu1 %v3398_v45  ;;  %v439_v44 = vld [vmem:[%s4327_s30 + $0x4f0] sm:$0xff]  ;;  %v436_v45 = vld [vmem:[%s4327_s30 + $0x4d8] sm:$0xff] }
 0x138   : > { %2003 = vmatprep.subr.bf16.mxu0 %v3405_v46  ;;  %2085 = vmatprep.subr.bf16.mxu1 %v3407_v47  ;;  %v440_v46 = vld [vmem:[%s4327_s30 + $0x4f8] sm:$0xff]  ;;  %v3462_v47 = vcombine.low %v428_v37, %v432_v38  ;;  %v3469_v48 = vcombine.high %v435_v43, %v439_v44  ;;  %v495_v37 = vld [vmem:[%s4327_s30 + $0x6b0] sm:$0xff] }
 0x139   : > { %v3471_v49 = vcombine.high %v436_v45, %v440_v46  ;;  %v492_v38 = vld [vmem:[%s4327_s30 + $0x698] sm:$0xff] }
 0x13b   : > { %2004 = vmatpush1.bf16.msra.mxu0 %v3404_v51  ;;  %2086 = vmatpush1.bf16.msra.mxu1 %v3406_v52  ;;  %v444_v51 = vld [vmem:[%s4327_s30 + $0x518] sm:$0xff] }
 0x13c   : > { %2005 = vmatprep.subr.bf16.mxu0 %v3413_v53  ;;  %2087 = vmatprep.subr.bf16.mxu1 %v3415_v54  ;;  %v448_v52 = vld [vmem:[%s4327_s30 + $0x538] sm:$0xff]  ;;  %v3468_v53 = vcombine.low %v435_v43, %v439_v44  ;;  %v3477_v54 = vcombine.high %v443_v57, %v447_v50  ;;  %v499_v44 = vld [vmem:[%s4327_s30 + $0x6d0] sm:$0xff] }
 0x13d   : > { %v3479_v55 = vcombine.high %v444_v51, %v448_v52 }
 0x13f   : > { %2006 = vmatpush1.bf16.msra.mxu0 %v3412_v60  ;;  %2088 = vmatpush1.bf16.msra.mxu1 %v3414_v61  ;;  %v456_v60 = vld [vmem:[%s4327_s30 + $0x578] sm:$0xff]  ;;  %v3476_v61 = vcombine.low %v443_v57, %v447_v50  ;;  %v507_v50 = vld [vmem:[%s4327_s30 + $0x710] sm:$0xff] }
 0x140   : > { %2007 = vmatprep.subr.bf16.mxu0 %v3421_v62  ;;  %2089 = vmatprep.subr.bf16.mxu1 %v3423_v63  ;;  %v3478_v62 = vcombine.low %v444_v51, %v448_v52  ;;  %v3485_v63 = vcombine.high %v451_v56, %v455_v58  ;;  %v3487_v0 = vcombine.high %v452_v59, %v456_v60  ;;  %v511_v51 = vld [vmem:[%s4327_s30 + $0x730] sm:$0xff]  ;;  %v508_v52 = vld [vmem:[%s4327_s30 + $0x718] sm:$0xff] }
 0x143   : > { %2008 = vmatpush1.bf16.msra.mxu0 %v3420_v4  ;;  %2090 = vmatpush1.bf16.msra.mxu1 %v3422_v5  ;;  %v464_v4 = vld [vmem:[%s4327_s30 + $0x5b8] sm:$0xff]  ;;  %v3484_v5 = vcombine.low %v451_v56, %v455_v58  ;;  %v515_v58 = vld [vmem:[%s4327_s30 + $0x750] sm:$0xff] }
 0x144   : > { %2009 = vmatprep.subr.bf16.mxu0 %v3429_v6  ;;  %2091 = vmatprep.subr.bf16.mxu1 %v3431_v7  ;;  %v3486_v6 = vcombine.low %v452_v59, %v456_v60  ;;  %v3493_v7 = vcombine.high %v459_v1, %v463_v2  ;;  %v3495_v8 = vcombine.high %v460_v3, %v464_v4  ;;  %v519_v59 = vld [vmem:[%s4327_s30 + $0x770] sm:$0xff]  ;;  %v516_v60 = vld [vmem:[%s4327_s30 + $0x758] sm:$0xff] }
 0x147   : > { %2010 = vmatpush1.bf16.msra.mxu0 %v3428_v13  ;;  %2092 = vmatpush1.bf16.msra.mxu1 %v3430_v14  ;;  %v472_v13 = vld [vmem:[%s4327_s30 + $0x5f8] sm:$0xff]  ;;  %v3492_v14 = vcombine.low %v459_v1, %v463_v2  ;;  %v523_v2 = vld [vmem:[%s4327_s30 + $0x790] sm:$0xff] }
 0x148   : > { %2011 = vmatprep.subr.bf16.mxu0 %v3437_v15  ;;  %2093 = vmatprep.subr.bf16.mxu1 %v3439_v16  ;;  %v3494_v15 = vcombine.low %v460_v3, %v464_v4  ;;  %v3501_v16 = vcombine.high %v467_v9, %v471_v10  ;;  %v3503_v17 = vcombine.high %v468_v11, %v472_v13  ;;  %v527_v3 = vld [vmem:[%s4327_s30 + $0x7b0] sm:$0xff]  ;;  %v524_v4 = vld [vmem:[%s4327_s30 + $0x798] sm:$0xff] }
 0x14b   : > { %2012 = vmatpush1.bf16.msra.mxu0 %v3436_v23  ;;  %2094 = vmatpush1.bf16.msra.mxu1 %v3438_v24  ;;  %v480_v23 = vld [vmem:[%s4327_s30 + $0x638] sm:$0xff]  ;;  %v3500_v24 = vcombine.low %v467_v9, %v471_v10  ;;  %v531_v10 = vld [vmem:[%s4327_s30 + $0x7d0] sm:$0xff] }
 0x14c   : > { %2022 = vmatprep.subr.bf16.mxu0 %v3445_v25  ;;  %2104 = vmatprep.subr.bf16.mxu1 %v3447_v26  ;;  %v3502_v25 = vcombine.low %v468_v11, %v472_v13  ;;  %v3509_v26 = vcombine.high %v475_v18, %v479_v19  ;;  %v3511_v27 = vcombine.high %v476_v20, %v480_v23  ;;  %v535_v11 = vld [vmem:[%s4327_s30 + $0x7f0] sm:$0xff]  ;;  %v532_v13 = vld [vmem:[%s4327_s30 + $0x7d8] sm:$0xff] }
 0x14e   : > { %2014 = vmatmul.mubr.bf16.vlgmr.msra.gmra.mrb[4].mxu0 %v4417_v12  ;;  %2096 = vmatmul.mubr.bf16.vlgmr.msra.gmra.mrb[4].mxu1 %v4417_v12  ;;  %v3460_v12 = vcombine.low %v427_v35, %v431_v36  ;;  %v491_v36 = vld [vmem:[%s4327_s30 + $0x690] sm:$0xff] }
 0x14f   : > { %2023 = vmatpush1.bf16.msra.mxu0 %v3444_v31  ;;  %2105 = vmatpush1.bf16.msra.mxu1 %v3446_v32  ;;  %v488_v31 = vld [vmem:[%s4327_s30 + $0x678] sm:$0xff]  ;;  %v3508_v32 = vcombine.low %v475_v18, %v479_v19  ;;  %v3564_v19 = vcombine.low %v531_v10, %v535_v11 }
 0x150   : > { %2024 = vmatprep.subr.bf16.mxu0 %v3453_v33  ;;  %2106 = vmatprep.subr.bf16.mxu1 %v3455_v34  ;;  %v3510_v33 = vcombine.low %v476_v20, %v480_v23  ;;  %v3517_v34 = vcombine.high %v483_v28, %v487_v29  ;;  %v3519_v35 = vcombine.high %v484_v30, %v488_v31 }
 0x151   : > { %2054 = vmatprep.mubr.bf16.mxu0 %v4424_v22  ;;  %2136 = vmatprep.mubr.bf16.mxu1 %v4424_v22  ;;  %v3470_v22 = vcombine.low %v436_v45, %v440_v46  ;;  %v503_v45 = vld [vmem:[%s4327_s30 + $0x6f0] sm:$0xff]  ;;  %v500_v46 = vld [vmem:[%s4327_s30 + $0x6d8] sm:$0xff] }
 0x153   : > { %2025 = vmatpush1.bf16.msra.mxu0 %v3452_v39  ;;  %2107 = vmatpush1.bf16.msra.mxu1 %v3454_v40  ;;  %v496_v39 = vld [vmem:[%s4327_s30 + $0x6b8] sm:$0xff]  ;;  %v3516_v40 = vcombine.low %v483_v28, %v487_v29 }
 0x154   : > { %2026 = vmatprep.subr.bf16.mxu0 %v3461_v41  ;;  %2108 = vmatprep.subr.bf16.mxu1 %v3463_v42  ;;  %v3518_v41 = vcombine.low %v484_v30, %v488_v31  ;;  %v3525_v42 = vcombine.high %v491_v36, %v495_v37  ;;  %v3527_v43 = vcombine.high %v492_v38, %v496_v39 }
 0x157   : > { %2027 = vmatpush1.bf16.msra.mxu0 %v3460_v12  ;;  %2109 = vmatpush1.bf16.msra.mxu1 %v3462_v47  ;;  %v504_v12 = vld [vmem:[%s4327_s30 + $0x6f8] sm:$0xff]  ;;  %v3524_v47 = vcombine.low %v491_v36, %v495_v37 }
 0x158   : > { %2028 = vmatprep.subr.bf16.mxu0 %v3469_v48  ;;  %2110 = vmatprep.subr.bf16.mxu1 %v3471_v49  ;;  %v3526_v48 = vcombine.low %v492_v38, %v496_v39  ;;  %v3533_v49 = vcombine.high %v499_v44, %v503_v45  ;;  %v3535_v57 = vcombine.high %v500_v46, %v504_v12 }
 0x15b   : > { %2029 = vmatpush1.bf16.msra.mxu0 %v3468_v53  ;;  %2111 = vmatpush1.bf16.msra.mxu1 %v3470_v22  ;;  %v512_v53 = vld [vmem:[%s4327_s30 + $0x738] sm:$0xff]  ;;  %v3532_v22 = vcombine.low %v499_v44, %v503_v45 }
 0x15c   : > { %2030 = vmatprep.subr.bf16.mxu0 %v3477_v54  ;;  %2112 = vmatprep.subr.bf16.mxu1 %v3479_v55  ;;  %v3534_v54 = vcombine.low %v500_v46, %v504_v12  ;;  %v3541_v55 = vcombine.high %v507_v50, %v511_v51  ;;  %v3543_v56 = vcombine.high %v508_v52, %v512_v53 }
 0x15f   : > { %2031 = vmatpush1.bf16.msra.mxu0 %v3476_v61  ;;  %2113 = vmatpush1.bf16.msra.mxu1 %v3478_v62  ;;  %v520_v61 = vld [vmem:[%s4327_s30 + $0x778] sm:$0xff]  ;;  %v3540_v62 = vcombine.low %v507_v50, %v511_v51 }
 0x160   : > { %2032 = vmatprep.subr.bf16.mxu0 %v3485_v63  ;;  %2114 = vmatprep.subr.bf16.mxu1 %v3487_v0  ;;  %v3542_v63 = vcombine.low %v508_v52, %v512_v53  ;;  %v3549_v0 = vcombine.high %v515_v58, %v519_v59  ;;  %v3551_v1 = vcombine.high %v516_v60, %v520_v61 }
 0x163   : > { %2033 = vmatpush1.bf16.msra.mxu0 %v3484_v5  ;;  %2115 = vmatpush1.bf16.msra.mxu1 %v3486_v6  ;;  %v528_v5 = vld [vmem:[%s4327_s30 + $0x7b8] sm:$0xff]  ;;  %v3548_v6 = vcombine.low %v515_v58, %v519_v59 }
 0x164   : > { %2034 = vmatprep.subr.bf16.mxu0 %v3493_v7  ;;  %2116 = vmatprep.subr.bf16.mxu1 %v3495_v8  ;;  %v3550_v7 = vcombine.low %v516_v60, %v520_v61  ;;  %v3557_v8 = vcombine.high %v523_v2, %v527_v3  ;;  %v3559_v9 = vcombine.high %v524_v4, %v528_v5 }
 0x167   : > { %2035 = vmatpush1.bf16.msra.mxu0 %v3492_v14  ;;  %2117 = vmatpush1.bf16.msra.mxu1 %v3494_v15  ;;  %v536_v14 = vld [vmem:[%s4327_s30 + $0x7f8] sm:$0xff]  ;;  %v3556_v15 = vcombine.low %v523_v2, %v527_v3 }
 0x168   : > { %2036 = vmatprep.subr.bf16.mxu0 %v3501_v16  ;;  %2118 = vmatprep.subr.bf16.mxu1 %v3503_v17  ;;  %v3558_v16 = vcombine.low %v524_v4, %v528_v5  ;;  %v3565_v17 = vcombine.high %v531_v10, %v535_v11  ;;  %v3567_v18 = vcombine.high %v532_v13, %v536_v14 }
 0x169   : > { %v3566_v20 = vcombine.low %v532_v13, %v536_v14 }
 0x16b   : > { %2037 = vmatpush1.bf16.msra.mxu0 %v3500_v24  ;;  %2119 = vmatpush1.bf16.msra.mxu1 %v3502_v25 }
 0x16c   : > { %2038 = vmatprep.subr.bf16.mxu0 %v3509_v26  ;;  %2120 = vmatprep.subr.bf16.mxu1 %v3511_v27 }
 0x16f   : > { %2039 = vmatpush1.bf16.msra.mxu0 %v3508_v32  ;;  %2121 = vmatpush1.bf16.msra.mxu1 %v3510_v33 }
 0x170   : > { %2040 = vmatprep.subr.bf16.mxu0 %v3517_v34  ;;  %2122 = vmatprep.subr.bf16.mxu1 %v3519_v35 }
 0x173   : > { %2041 = vmatpush1.bf16.msra.mxu0 %v3516_v40  ;;  %2123 = vmatpush1.bf16.msra.mxu1 %v3518_v41 }
 0x174   : > { %2042 = vmatprep.subr.bf16.mxu0 %v3525_v42  ;;  %2124 = vmatprep.subr.bf16.mxu1 %v3527_v43 }
 0x177   : > { %2043 = vmatpush1.bf16.msra.mxu0 %v3524_v47  ;;  %2125 = vmatpush1.bf16.msra.mxu1 %v3526_v48 }
 0x178   : > { %2044 = vmatprep.subr.bf16.mxu0 %v3533_v49  ;;  %2126 = vmatprep.subr.bf16.mxu1 %v3535_v57 }
 0x17b   : > { %2045 = vmatpush1.bf16.msra.mxu0 %v3532_v22  ;;  %2127 = vmatpush1.bf16.msra.mxu1 %v3534_v54 }
 0x17c   : > { %2046 = vmatprep.subr.bf16.mxu0 %v3541_v55  ;;  %2128 = vmatprep.subr.bf16.mxu1 %v3543_v56 }
 0x17f   : > { %2047 = vmatpush1.bf16.msra.mxu0 %v3540_v62  ;;  %2129 = vmatpush1.bf16.msra.mxu1 %v3542_v63 }
 0x180   : > { %2048 = vmatprep.subr.bf16.mxu0 %v3549_v0  ;;  %2130 = vmatprep.subr.bf16.mxu1 %v3551_v1 }
 0x183   : > { %2049 = vmatpush1.bf16.msra.mxu0 %v3548_v6  ;;  %2131 = vmatpush1.bf16.msra.mxu1 %v3550_v7 }
 0x184   : > { %2050 = vmatprep.subr.bf16.mxu0 %v3557_v8  ;;  %2132 = vmatprep.subr.bf16.mxu1 %v3559_v9 }
 0x187   : > { %2051 = vmatpush1.bf16.msra.mxu0 %v3556_v15  ;;  %2133 = vmatpush1.bf16.msra.mxu1 %v3558_v16 }
 0x188   : > { %2052 = vmatprep.subr.bf16.mxu0 %v3565_v17  ;;  %2134 = vmatprep.subr.bf16.mxu1 %v3567_v18 }
 0x18b   : > { %2053 = vmatpush1.bf16.msra.mxu0 %v3564_v19  ;;  %2135 = vmatpush1.bf16.msra.mxu1 %v3566_v20 }
 0x18e   : > { %2055 = vmatmul.mubr.bf16.vlgmr.msra.gmra.mrb[4].mxu0 %v4491_v21  ;;  %2137 = vmatmul.mubr.bf16.vlgmr.msra.gmra.mrb[4].mxu1 %v4491_v21 }
 0x1e1   : > { %v1892_v23 = vpop.f32.mrb[0].mxu0  ;;  %v1974_v24 = vpop.f32.mrb[0].mxu1 }
 0x1e2   : > { %v1894_v25 = vpop.f32.mrb[1].mxu0  ;;  %v1976_v26 = vpop.f32.mrb[1].mxu1  ;;  %2149 = vst [vmem:[#allocation2] sm:$0xff] (!%p4804_p6), %v1892_v23  ;;  %2151 = vst [vmem:[#allocation2 + $0x10] sm:$0xff] (!%p4804_p6), %v1974_v24 }
 0x1e3   : > { %v1896_v27 = vpop.f32.mrb[2].mxu0  ;;  %v1978_v28 = vpop.f32.mrb[2].mxu1  ;;  %2150 = vst [vmem:[#allocation2 + $0x8] sm:$0xff] (!%p4804_p6), %v1894_v25  ;;  %2152 = vst [vmem:[#allocation2 + $0x18] sm:$0xff] (!%p4804_p6), %v1976_v26 }
 0x1e4   : > { %v1897_v29 = vpop.f32.mrb[3].mxu0  ;;  %v1979_v30 = vpop.f32.mrb[3].mxu1 }
 0x25e   : > { %2148 = sbr.rel (%p4804_p6) target bundleno = 613 (0x265), region = 56 }
 0x261   : > { %v2056_v31 = vpop.f32.mrb[4].mxu0  ;;  %v2138_v32 = vpop.f32.mrb[4].mxu1 }
 0x262   : > { %v2058_v33 = vpop.f32.mrb[5].mxu0  ;;  %v2140_v34 = vpop.f32.mrb[5].mxu1  ;;  %2153 = vst [vmem:[#allocation2 + $0x20] sm:$0xff] (!%p4804_p6), %v2056_v31  ;;  %2155 = vst [vmem:[#allocation2 + $0x30] sm:$0xff] (!%p4804_p6), %v2138_v32 }
 0x263   : > { %v2060_v35 = vpop.f32.mrb[6].mxu0  ;;  %v2142_v36 = vpop.f32.mrb[6].mxu1  ;;  %2154 = vst [vmem:[#allocation2 + $0x28] sm:$0xff] (!%p4804_p6), %v2058_v33  ;;  %2156 = vst [vmem:[#allocation2 + $0x38] sm:$0xff] (!%p4804_p6), %v2140_v34 }
 0x264   : > { %v2061_v37 = vpop.f32.mrb[7].mxu0  ;;  %v2143_v38 = vpop.f32.mrb[7].mxu1 }
 0x265 PF: > { %p4805_p12 = scmp.eq.s32.totalorder %s4150_s19, 0 }
 0x266   : > { %v2161_v21 = vld [vmem:[#allocation2] sm:$0xff] (!%p4805_p12)  ;;  %v2162_v39 = vld [vmem:[#allocation2 + $0x8] sm:$0xff] (!%p4805_p12)  ;;  %v2163_v40 = vld [vmem:[#allocation2 + $0x10] sm:$0xff] (!%p4805_p12) }
 0x267   : > { %2160 = sbr.rel (%p4805_p12) target bundleno = 622 (0x26e), region = 60  ;;  %v2169_v41 = vadd.f32 (!%p4805_p12), %v2161_v21, %v1892_v23  ;;  %v2170_v42 = vadd.f32 (!%p4805_p12), %v2162_v39, %v1894_v25  ;;  %v2171_v43 = vadd.f32 (!%p4805_p12), %v2163_v40, %v1974_v24  ;;  %v2164_v44 = vld [vmem:[#allocation2 + $0x18] sm:$0xff] (!%p4805_p12) }
 0x268   : > { %v2172_v12 = vadd.f32 (!%p4805_p12), %v2164_v44, %v1976_v26 }
 0x269   : > { %v2165_v45 = vld [vmem:[#allocation2 + $0x20] sm:$0xff] (!%p4805_p12)  ;;  %v2167_v49 = vld [vmem:[#allocation2 + $0x30] sm:$0xff] (!%p4805_p12)  ;;  %2177 = vst [vmem:[#allocation2] sm:$0xff] (!%p4805_p12), %v2169_v41  ;;  %2178 = vst [vmem:[#allocation2 + $0x8] sm:$0xff] (!%p4805_p12), %v2170_v42 }
 0x26a   : > { %v2166_v46 = vld [vmem:[#allocation2 + $0x28] sm:$0xff] (!%p4805_p12)  ;;  %v2173_v47 = vadd.f32 (!%p4805_p12), %v2165_v45, %v2056_v31  ;;  %v2168_v57 = vld [vmem:[#allocation2 + $0x38] sm:$0xff] (!%p4805_p12)  ;;  %2179 = vst [vmem:[#allocation2 + $0x10] sm:$0xff] (!%p4805_p12), %v2171_v43  ;;  %v2175_v50 = vadd.f32 (!%p4805_p12), %v2167_v49, %v2138_v32  ;;  %2180 = vst [vmem:[#allocation2 + $0x18] sm:$0xff] (!%p4805_p12), %v2172_v12 }
 0x26b   : > { %v2174_v48 = vadd.f32 (!%p4805_p12), %v2166_v46, %v2058_v33  ;;  %v2176_v51 = vadd.f32 (!%p4805_p12), %v2168_v57, %v2140_v34 }
 0x26c   : > { %2181 = vst [vmem:[#allocation2 + $0x20] sm:$0xff] (!%p4805_p12), %v2173_v47  ;;  %2183 = vst [vmem:[#allocation2 + $0x30] sm:$0xff] (!%p4805_p12), %v2175_v50 }
 0x26d   : > { %2182 = vst [vmem:[#allocation2 + $0x28] sm:$0xff] (!%p4805_p12), %v2174_v48  ;;  %2184 = vst [vmem:[#allocation2 + $0x38] sm:$0xff] (!%p4805_p12), %v2176_v51 }
 0x26e PF: > { %p3570_p0 = scmp.ne.s32.totalorder %s4150_s19, 3 }
 0x26f   : > { %v3823_v52 = vld [vmem:[#allocation9 + $0x40] sm:$0xff] (!%p3570_p0)   ;;  %v3827_v55 = vld [vmem:[#allocation9 + $0x48] sm:$0xff] (!%p3570_p0)   ;;  %v3831_v60 = vld [vmem:[#allocation9 + $0x50] sm:$0xff] (!%p3570_p0)   ;;  %v2204_v9 = vlaneseq (!%p3570_p0) }
 0x270   : > { %2188 = sbr.rel (%p3570_p0) target bundleno = 949 (0x3b5), region = 64  ;;  %v3824_v53 = vld [vmem:[#allocation9 + $0xc0] sm:$0xff] (!%p3570_p0)   ;;  %3643 = vmatprep.subr.bf16.mxu0 (!%p3570_p0), %v3823_v52  ;;  %v3828_v56 = vld [vmem:[#allocation9 + $0xc8] sm:$0xff] (!%p3570_p0)   ;;  %v3832_v61 = vld [vmem:[#allocation9 + $0xd0] sm:$0xff] (!%p3570_p0)  }
 0x271   : > { %v3825_v22 = vld [vmem:[#allocation9] sm:$0xff] (!%p3570_p0)   ;;  %3665 = vmatprep.subr.bf16.mxu1 (!%p3570_p0), %v3824_v53  ;;  %v3829_v58 = vld [vmem:[#allocation9 + $0x8] sm:$0xff] (!%p3570_p0)   ;;  %v3833_v62 = vld [vmem:[#allocation9 + $0x10] sm:$0xff] (!%p3570_p0)   ;;  %v4630_v15 = vshrl.u32 (!%p3570_p0), %v2204_v9, 7 }
 0x272   : > { %v3826_v54 = vld [vmem:[#allocation9 + $0x80] sm:$0xff] (!%p3570_p0)   ;;  %3644 = vmatpush3.bf16.msra.mxu0 (!%p3570_p0), %v3825_v22  ;;  %v3830_v59 = vld [vmem:[#allocation9 + $0x88] sm:$0xff] (!%p3570_p0)   ;;  %v3834_v63 = vld [vmem:[#allocation9 + $0x90] sm:$0xff] (!%p3570_p0)  }
 0x273   : > { %3666 = vmatpush3.bf16.msra.mxu1 (!%p3570_p0), %v3826_v54  ;;  %3645 = vmatprep.subr.bf16.mxu0 (!%p3570_p0), %v3827_v55  ;;  %v3835_v0 = vld [vmem:[#allocation9 + $0x58] sm:$0xff] (!%p3570_p0)   ;;  %v3839_v4 = vld [vmem:[#allocation9 + $0x60] sm:$0xff] (!%p3570_p0)   ;;  %v3843_v8 = vld [vmem:[#allocation9 + $0x68] sm:$0xff] (!%p3570_p0)   ;;  %v4633_v20 = vsub.s32 (!%p3570_p0), 1, %v4630_v15  ;;  %v4636_v24 = vsub.s32 (!%p3570_p0), 3, %v4630_v15  ;;  %v4639_v26 = vsub.s32 (!%p3570_p0), 0, %v4630_v15 }
 0x274   : > { %3667 = vmatprep.subr.bf16.mxu1 (!%p3570_p0), %v3828_v56  ;;  %v3836_v1 = vld [vmem:[#allocation9 + $0xd8] sm:$0xff] (!%p3570_p0)   ;;  %v3840_v5 = vld [vmem:[#allocation9 + $0xe0] sm:$0xff] (!%p3570_p0)   ;;  %v3844_v10 = vld [vmem:[#allocation9 + $0xe8] sm:$0xff] (!%p3570_p0)   ;;  %v4642_v28 = vsub.s32 (!%p3570_p0), 2, %v4630_v15 }
 0x275   : > { %v3837_v2 = vld [vmem:[#allocation9 + $0x18] sm:$0xff] (!%p3570_p0)   ;;  %v3841_v6 = vld [vmem:[#allocation9 + $0x20] sm:$0xff] (!%p3570_p0)   ;;  %v3845_v11 = vld [vmem:[#allocation9 + $0x28] sm:$0xff] (!%p3570_p0)  }
 0x276   : > { %3646 = vmatpush3.bf16.msra.mxu0 (!%p3570_p0), %v3829_v58  ;;  %v3838_v3 = vld [vmem:[#allocation9 + $0x98] sm:$0xff] (!%p3570_p0)   ;;  %v3842_v7 = vld [vmem:[#allocation9 + $0xa0] sm:$0xff] (!%p3570_p0)   ;;  %v3846_v13 = vld [vmem:[#allocation9 + $0xa8] sm:$0xff] (!%p3570_p0)  }
 0x277   : > { %3668 = vmatpush3.bf16.msra.mxu1 %v3830_v59  ;;  %3647 = vmatprep.subr.bf16.mxu0 %v3831_v60  ;;  %v3847_v14 = vld [vmem:[#allocation9 + $0x70] sm:$0xff]   ;;  %v3851_v19 = vld [vmem:[#allocation9 + $0x78] sm:$0xff]   ;;  %v2196_v30 = vld [vmem:[#allocation2 + $0x8] sm:$0xff] }
 0x278   : > { %3669 = vmatprep.subr.bf16.mxu1 %v3832_v61  ;;  %v3848_v16 = vld [vmem:[#allocation9 + $0xf0] sm:$0xff]   ;;  %v3852_v23 = vld [vmem:[#allocation9 + $0xf8] sm:$0xff]   ;;  %v3855_v34 = vld [vmem:[#allocation9 + $0x140] sm:$0xff]  }
 0x279   : > { %v3849_v17 = vld [vmem:[#allocation9 + $0x30] sm:$0xff]   ;;  %v3853_v25 = vld [vmem:[#allocation9 + $0x38] sm:$0xff]   ;;  %v3856_v38 = vld [vmem:[#allocation9 + $0x1c0] sm:$0xff]  }
 0x27a   : > { %3648 = vmatpush3.bf16.msra.mxu0 %v3833_v62  ;;  %v3850_v18 = vld [vmem:[#allocation9 + $0xb0] sm:$0xff]   ;;  %v3854_v27 = vld [vmem:[#allocation9 + $0xb8] sm:$0xff]   ;;  %v2195_v21 = vld [vmem:[#allocation2] sm:$0xff] }
 0x27b   : > { %3670 = vmatpush3.bf16.msra.mxu1 %v3834_v63  ;;  %3649 = vmatprep.subr.bf16.mxu0 %v3835_v0  ;;  %v4644_v29 = vld [vmem:[#allocation8] ss:$4 sm:$0xff] }
 0x27c   : > { %3671 = vmatprep.subr.bf16.mxu1 %v3836_v1  ;;  %v2211_v31 = vrot.slane %v4644_v29, %v4633_v20  ;;  %v2198_v32 = vld [vmem:[#allocation2 + $0x18] sm:$0xff]  ;;  %v2219_v33 = vrot.slane %v4644_v29, %v4636_v24  ;;  %v2207_v35 = vrot.slane %v4644_v29, %v4639_v26  ;;  %v2215_v39 = vrot.slane %v4644_v29, %v4642_v28  ;;  %v2197_v41 = vld [vmem:[#allocation2 + $0x10] sm:$0xff] }
 0x27e   : > { %3650 = vmatpush3.bf16.msra.mxu0 %v3837_v2  ;;  %v2245_v36 = vadd.f32 %v2211_v31, %v2196_v30  ;;  %v2247_v37 = vadd.f32 %v2219_v33, %v2198_v32  ;;  %v2244_v40 = vadd.f32 %v2207_v35, %v2195_v21  ;;  %v2246_v44 = vadd.f32 %v2215_v39, %v2197_v41 }
 0x27f   : > { %3672 = vmatpush3.bf16.msra.mxu1 %v3838_v3  ;;  %3651 = vmatprep.subr.bf16.mxu0 %v3839_v4 }
 0x280   : > { %3673 = vmatprep.subr.bf16.mxu1 %v3840_v5  ;;  %v2258_v42 = vrot.slane %v2245_v36, 4  ;;  %v2270_v43 = vrot.slane %v2247_v37, 4  ;;  %v2252_v45 = vrot.slane %v2244_v40, 4  ;;  %v2264_v47 = vrot.slane %v2246_v44, 4 }
 0x282   : > { %3652 = vmatpush3.bf16.msra.mxu0 %v3841_v6  ;;  %v2259_v46 = vadd.f32 %v2258_v42, %v2245_v36  ;;  %v2271_v12 = vadd.f32 %v2270_v43, %v2247_v37  ;;  %v2253_v48 = vadd.f32 %v2252_v45, %v2244_v40  ;;  %v2265_v50 = vadd.f32 %v2264_v47, %v2246_v44 }
 0x283   : > { %3674 = vmatpush3.bf16.msra.mxu1 %v3842_v7  ;;  %3653 = vmatprep.subr.bf16.mxu0 %v3843_v8 }
 0x284   : > { %3675 = vmatprep.subr.bf16.mxu1 %v3844_v10  ;;  %v2260_v49 = vrot.slane %v2259_v46, 2  ;;  %v2272_v57 = vrot.slane %v2271_v12, 2  ;;  %v2254_v51 = vrot.slane %v2253_v48, 2  ;;  %v2266_v22 = vrot.slane %v2265_v50, 2 }
 0x286   : > { %3654 = vmatpush3.bf16.msra.mxu0 %v3845_v11  ;;  %v2261_v52 = vadd.f32 %v2260_v49, %v2259_v46  ;;  %v2273_v53 = vadd.f32 %v2272_v57, %v2271_v12  ;;  %v2255_v54 = vadd.f32 %v2254_v51, %v2253_v48  ;;  %v2267_v58 = vadd.f32 %v2266_v22, %v2265_v50  ;;  %v2200_v57 = vld [vmem:[#allocation2 + $0x28] sm:$0xff]  ;;  %v2202_v50 = vld [vmem:[#allocation2 + $0x38] sm:$0xff] }
 0x287   : > { %3676 = vmatpush3.bf16.msra.mxu1 %v3846_v13  ;;  %3655 = vmatprep.subr.bf16.mxu0 %v3847_v14 }
 0x288   : > { %3677 = vmatprep.subr.bf16.mxu1 %v3848_v16  ;;  %v2262_v55 = vrot.slane %v2261_v52, 1  ;;  %v2274_v56 = vrot.slane %v2273_v53, 1  ;;  %v2256_v59 = vrot.slane %v2255_v54, 1  ;;  %v2268_v62 = vrot.slane %v2267_v58, 1 }
 0x28a   : > { %3656 = vmatpush3.bf16.msra.mxu0 %v3849_v17  ;;  %v2263_v60 = vadd.f32 %v2262_v55, %v2261_v52  ;;  %v2275_v61 = vadd.f32 %v2274_v56, %v2273_v53  ;;  %v2257_v63 = vadd.f32 %v2256_v59, %v2255_v54  ;;  %v2269_v2 = vadd.f32 %v2268_v62, %v2267_v58  ;;  %v2199_v54 = vld [vmem:[#allocation2 + $0x20] sm:$0xff]  ;;  %v2201_v55 = vld [vmem:[#allocation2 + $0x30] sm:$0xff] }
 0x28b   : > { %3678 = vmatpush3.bf16.msra.mxu1 %v3850_v18  ;;  %3657 = vmatprep.subr.bf16.mxu0 %v3851_v19  ;;  %v4671_v18 = vsub.s32 5, %v4630_v15 }
 0x28c   : > { %3679 = vmatprep.subr.bf16.mxu1 %v3852_v23  ;;  %v2302_v0 = vmul.f32 0.125, %v2263_v60  ;;  %v2304_v1 = vmul.f32 0.125, %v2275_v61  ;;  %v2301_v3 = vmul.f32 0.125, %v2257_v63  ;;  %v2303_v6 = vmul.f32 0.125, %v2269_v2 }
 0x28d   : > { %v2227_v43 = vrot.slane %v4644_v29, %v4671_v18 }
 0x28e   : > { %3658 = vmatpush3.bf16.msra.mxu0 %v3853_v25  ;;  %v4654_v4 = vsub.f32 %v2245_v36, %v2302_v0  ;;  %v4656_v5 = vsub.f32 %v2247_v37, %v2304_v1  ;;  %v4658_v7 = vsub.f32 %v2244_v40, %v2301_v3  ;;  %v4664_v10 = vsub.f32 %v2246_v44, %v2303_v6 }
 0x28f   : > { %3680 = vmatpush3.bf16.msra.mxu1 %v3854_v27  ;;  %3687 = vmatprep.subr.bf16.mxu0 %v3855_v34  ;;  %v4674_v27 = vsub.s32 7, %v4630_v15  ;;  %v4677_v34 = vsub.s32 4, %v4630_v15  ;;  %v4680_v36 = vsub.s32 6, %v4630_v15  ;;  %v2249_v22 = vadd.f32 %v2227_v43, %v2200_v57 }
 0x290   : > { %3709 = vmatprep.subr.bf16.mxu1 %v3856_v38  ;;  %v2318_v8 = vmul.f32 %v4654_v4, %v4654_v4  ;;  %v2320_v9 = vmul.f32 %v4656_v5, %v4656_v5  ;;  %v2317_v11 = vmul.f32 %v4658_v7, %v4658_v7  ;;  %v2319_v16 = vmul.f32 %v4664_v10, %v4664_v10 }
 0x291   : > { %v2235_v45 = vrot.slane %v4644_v29, %v4674_v27  ;;  %v2223_v46 = vrot.slane %v4644_v29, %v4677_v34  ;;  %v2231_v15 = vrot.slane %v4644_v29, %v4680_v36  ;;  %v2282_v29 = vrot.slane %v2249_v22, 4 }
 0x292   : > { %v2331_v13 = vrot.slane %v2318_v8, 4  ;;  %v2343_v14 = vrot.slane %v2320_v9, 4  ;;  %v2325_v17 = vrot.slane %v2317_v11, 4  ;;  %v2337_v25 = vrot.slane %v2319_v16, 4 }
 0x293   : > { %v2251_v58 = vadd.f32 %v2235_v45, %v2202_v50  ;;  %v2248_v59 = vadd.f32 %v2223_v46, %v2199_v54  ;;  %v2250_v60 = vadd.f32 %v2231_v15, %v2201_v55 }
 0x294   : > { %v2332_v19 = vadd.f32 %v2331_v13, %v2318_v8  ;;  %v2344_v23 = vadd.f32 %v2343_v14, %v2320_v9  ;;  %v2326_v30 = vadd.f32 %v2325_v17, %v2317_v11  ;;  %v2338_v33 = vadd.f32 %v2337_v25, %v2319_v16  ;;  %v4690_v25 = vld [vmem:[#allocation8 + $0x1] ss:$4 sm:$0xff] }
 0x295   : > { %v2294_v1 = vrot.slane %v2251_v58, 4  ;;  %v2276_v2 = vrot.slane %v2248_v59, 4  ;;  %v2288_v3 = vrot.slane %v2250_v60, 4  ;;  %v2283_v8 = vadd.f32 %v2282_v29, %v2249_v22 }
 0x296   : > { %v2333_v31 = vrot.slane %v2332_v19, 2  ;;  %v2345_v32 = vrot.slane %v2344_v23, 2  ;;  %v2327_v35 = vrot.slane %v2326_v30, 2  ;;  %v2339_v21 = vrot.slane %v2338_v33, 2 }
 0x297   : > { %v2295_v9 = vadd.f32 %v2294_v1, %v2251_v58  ;;  %v2277_v11 = vadd.f32 %v2276_v2, %v2248_v59  ;;  %v2289_v13 = vadd.f32 %v2288_v3, %v2250_v60  ;;  %v2284_v14 = vrot.slane %v2283_v8, 2 }
 0x298   : > { %v2334_v37 = vadd.f32 %v2333_v31, %v2332_v19  ;;  %v2346_v38 = vadd.f32 %v2345_v32, %v2344_v23  ;;  %v2328_v39 = vadd.f32 %v2327_v35, %v2326_v30  ;;  %v2340_v42 = vadd.f32 %v2339_v21, %v2338_v33  ;;  %v4692_v30 = vld [vmem:[#allocation8 + $0x2] ss:$4 sm:$0xff] }
 0x299   : > { %v2296_v16 = vrot.slane %v2295_v9, 2  ;;  %v2278_v17 = vrot.slane %v2277_v11, 2  ;;  %v2290_v19 = vrot.slane %v2289_v13, 2  ;;  %v2285_v23 = vadd.f32 %v2284_v14, %v2283_v8 }
 0x29a   : > { %v2335_v40 = vrot.slane %v2334_v37, 1  ;;  %v2347_v41 = vrot.slane %v2346_v38, 1  ;;  %v2329_v44 = vrot.slane %v2328_v39, 1  ;;  %v2341_v48 = vrot.slane %v2340_v42, 1 }
 0x29b   : > { %v2297_v31 = vadd.f32 %v2296_v16, %v2295_v9  ;;  %v2279_v32 = vadd.f32 %v2278_v17, %v2277_v11  ;;  %v2291_v33 = vadd.f32 %v2290_v19, %v2289_v13  ;;  %v2286_v35 = vrot.slane %v2285_v23, 1 }
 0x29c   : > { %v2336_v12 = vadd.f32 %v2335_v40, %v2334_v37  ;;  %v2348_v47 = vadd.f32 %v2347_v41, %v2346_v38  ;;  %v2330_v49 = vadd.f32 %v2329_v44, %v2328_v39  ;;  %v2342_v53 = vadd.f32 %v2341_v48, %v2340_v42 }
 0x29d   : > { %v2298_v37 = vrot.slane %v2297_v31, 1  ;;  %v2280_v38 = vrot.slane %v2279_v32, 1  ;;  %v2292_v21 = vrot.slane %v2291_v33, 1  ;;  %v2413_v39 = vrot.slane %v4690_v25, %v4633_v20 }
 0x29e   : > { %v2374_v51 = vmul.f32 0.125, %v2336_v12  ;;  %v2376_v52 = vmul.f32 0.125, %v2348_v47  ;;  %v2373_v56 = vmul.f32 0.125, %v2330_v49  ;;  %v2375_v63 = vmul.f32 0.125, %v2342_v53 }
 0x29f   : > { %v2462_v40 = vrot.slane %v4692_v30, %v4633_v20  ;;  %v2287_v41 = vadd.f32 %v2286_v35, %v2285_v23  ;;  %v2421_v42 = vrot.slane %v4690_v25, %v4636_v24  ;;  %v2299_v43 = vadd.f32 %v2298_v37, %v2297_v31 }
 0x2a0   : > { %v2382_v61 = vadd.f32 1e-05, %v2374_v51  ;;  %v2384_v62 = vadd.f32 1e-05, %v2376_v52  ;;  %v2381_v0 = vadd.f32 1e-05, %v2373_v56  ;;  %v2281_v44 = vadd.f32 %v2280_v38, %v2279_v32 }
 0x2a1   : > { %v2383_v6 = vadd.f32 1e-05, %v2375_v63  ;;  %v2293_v45 = vadd.f32 %v2292_v21, %v2291_v33  ;;  %v2470_v15 = vrot.slane %v4692_v30, %v4636_v24  ;;  %v2409_v12 = vrot.slane %v4690_v25, %v4639_v26  ;;  %v3857_v33 = vld [vmem:[#allocation9 + $0x100] sm:$0xff]  }
 0x2a2   : > { %3887 = vrsqrt.f32 %v2382_v61  ;;  %v2458_v47 = vrot.slane %v4692_v30, %v4639_v26  ;;  %v2306_v48 = vmul.f32 0.125, %v2287_v41  ;;  %v2308_v57 = vmul.f32 0.125, %v2299_v43  ;;  %v3858_v21 = vld [vmem:[#allocation9 + $0x180] sm:$0xff]   ;;  %v3860_v43 = vld [vmem:[#allocation9 + $0x1c8] sm:$0xff]  }
 0x2a3   : > { %3889 = vrsqrt.f32 %v2384_v62  ;;  %v2305_v50 = vmul.f32 0.125, %v2281_v44  ;;  %v2307_v51 = vmul.f32 0.125, %v2293_v45  ;;  %v2417_v54 = vrot.slane %v4690_v25, %v4642_v28 }
 0x2a4   : > { %3891 = vrsqrt.f32 %v2381_v0  ;;  %v2466_v24 = vrot.slane %v4692_v30, %v4642_v28  ;;  %v4712_v55 = vsub.f32 %v2249_v22, %v2306_v48  ;;  %v4715_v62 = vsub.f32 %v2251_v58, %v2308_v57 }
 0x2a5   : > { %3893 = vrsqrt.f32 %v2383_v6  ;;  %v4722_v0 = vsub.f32 %v2250_v60, %v2307_v51  ;;  %v3864_v51 = vld [vmem:[#allocation9 + $0x1d0] sm:$0xff]  }
 0x2a6   : > { %v2324_v22 = vmul.f32 %v4715_v62, %v4715_v62 }
 0x2a7   : > { %v2323_v3 = vmul.f32 %v4722_v0, %v4722_v0 }
 0x2a8   : > { %v2367_v8 = vrot.slane %v2324_v22, 4 }
 0x2a9   : > { %v2361_v14 = vrot.slane %v2323_v3, 4 }
 0x2aa   : > { %v2368_v19 = vadd.f32 %v2367_v8, %v2324_v22  ;;  %v3872_v8 = vld [vmem:[#allocation9 + $0x1e0] sm:$0xff]  }
 0x2ab   : > { %v2362_v37 = vadd.f32 %v2361_v14, %v2323_v3  ;;  %v3877_v14 = vld [vmem:[#allocation9 + $0x128] sm:$0xff]  }
 0x2ac   : > { %v3888_v46 = vpop.eup %3887 }
 0x2ad   : > { %v3890_v49 = vpop.eup %3889  ;;  %v2398_v20 = vmul.f32 %v3888_v46, %v4654_v4  ;;  %v4717_v4 = vsub.f32 %v2248_v59, %v2305_v50  ;;  %v2363_v45 = vrot.slane %v2362_v37, 2 }
 0x2ae   : > { %v3892_v52 = vpop.eup %3891  ;;  %v2400_v53 = vmul.f32 %v3890_v49, %v4656_v5  ;;  %v2322_v5 = vmul.f32 %v4712_v55, %v4712_v55  ;;  %v3862_v49 = vld [vmem:[#allocation9 + $0x188] sm:$0xff]  }
 0x2af   : > { %v3894_v56 = vpop.eup %3893  ;;  %v2447_v26 = vmul.f32 %v2413_v39, %v2398_v20  ;;  %v2397_v61 = vmul.f32 %v3892_v52, %v4658_v7  ;;  %v2321_v7 = vmul.f32 %v4717_v4, %v4717_v4  ;;  %v3859_v39 = vld [vmem:[#allocation9 + $0x148] sm:$0xff]   ;;  %v2364_v48 = vadd.f32 %v2363_v45, %v2362_v37  ;;  %v3863_v20 = vld [vmem:[#allocation9 + $0x150] sm:$0xff]  }
 0x2b0   : > { %v2449_v63 = vmul.f32 %v2421_v42, %v2400_v53  ;;  %v2399_v29 = vmul.f32 %v3894_v56, %v4664_v10  ;;  %v2355_v59 = vrot.slane %v2322_v5, 4  ;;  %v3865_v56 = vld [vmem:[#allocation9 + $0x110] sm:$0xff]   ;;  %v2478_v37 = vrot.slane %v4692_v30, %v4671_v18 }
 0x2b1   : > { %v2496_v1 = vadd.f32 %v2462_v40, %v2447_v26  ;;  %v2446_v28 = vmul.f32 %v2409_v12, %v2397_v61  ;;  %v2349_v9 = vrot.slane %v2321_v7, 4  ;;  %v2369_v40 = vrot.slane %v2368_v19, 2  ;;  %v3861_v12 = vld [vmem:[#allocation9 + $0x108] sm:$0xff]  }
 0x2b2   : > { %v2498_v58 = vadd.f32 %v2470_v15, %v2449_v63  ;;  %v2448_v2 = vmul.f32 %v2417_v54, %v2399_v29  ;;  %v2356_v13 = vadd.f32 %v2355_v59, %v2322_v5  ;;  %v2365_v53 = vrot.slane %v2364_v48, 1  ;;  %v3866_v63 = vld [vmem:[#allocation9 + $0x190] sm:$0xff]   ;;  %v3867_v29 = vld [vmem:[#allocation9 + $0x158] sm:$0xff]  }
 0x2b3   : > { %v2504_v10 = vmax.f32 %v2496_v1, 0.0  ;;  %v2495_v6 = vadd.f32 %v2458_v47, %v2446_v28  ;;  %v2350_v23 = vadd.f32 %v2349_v9, %v2321_v7  ;;  %v2370_v46 = vadd.f32 %v2369_v40, %v2368_v19  ;;  %v3868_v28 = vld [vmem:[#allocation9 + $0x1d8] sm:$0xff]   ;;  %v3873_v9 = vld [vmem:[#allocation9 + $0x120] sm:$0xff]  }
 0x2b4   : > { %v2506_v60 = vmax.f32 %v2498_v58, 0.0  ;;  %v2497_v11 = vadd.f32 %v2466_v24, %v2448_v2  ;;  %v2357_v35 = vrot.slane %v2356_v13, 2  ;;  %v2366_v61 = vadd.f32 %v2365_v53, %v2364_v48  ;;  %v3869_v59 = vld [vmem:[#allocation9 + $0x118] sm:$0xff]  }
 0x2b5   : > { %v2512_v16 = vpack.c.bf16 %v2504_v10, %v2504_v10  ;;  %v2503_v17 = vmax.f32 %v2495_v6, 0.0  ;;  %v2351_v41 = vrot.slane %v2350_v23, 2  ;;  %v2371_v57 = vrot.slane %v2370_v46, 1  ;;  %v3870_v10 = vld [vmem:[#allocation9 + $0x198] sm:$0xff]   ;;  %v3871_v6 = vld [vmem:[#allocation9 + $0x160] sm:$0xff]  }
 0x2b6   : > { %v2514_v31 = vpack.c.bf16 %v2506_v60, %v2506_v60  ;;  %v2505_v32 = vmax.f32 %v2497_v11, 0.0  ;;  %v2358_v44 = vadd.f32 %v2357_v35, %v2356_v13  ;;  %v2379_v7 = vmul.f32 0.125, %v2366_v61  ;;  %v3874_v60 = vld [vmem:[#allocation9 + $0x1a0] sm:$0xff]   ;;  %v3875_v11 = vld [vmem:[#allocation9 + $0x168] sm:$0xff]   ;;  %v3885_v48 = vld [vmem:[#allocation9 + $0x138] sm:$0xff]  }
 0x2b7   : > { %3067 = vmatprep.mubr.bf16.mxu0 %v2512_v16  ;;  %v2511_v38 = vpack.c.bf16 %v2503_v17, %v2503_v17  ;;  %v2352_v15 = vadd.f32 %v2351_v41, %v2350_v23  ;;  %v2372_v54 = vadd.f32 %v2371_v57, %v2370_v46  ;;  %v3876_v13 = vld [vmem:[#allocation9 + $0x1e8] sm:$0xff]   ;;  %v3879_v17 = vld [vmem:[#allocation9 + $0x170] sm:$0xff]   ;;  %v2429_v19 = vrot.slane %v4690_v25, %v4671_v18 }
 0x2b8   : > { %3107 = vmatprep.mubr.bf16.mxu1 %v2514_v31  ;;  %v2513_v42 = vpack.c.bf16 %v2505_v32, %v2505_v32  ;;  %v2359_v47 = vrot.slane %v2358_v44, 1  ;;  %v2387_v3 = vadd.f32 1e-05, %v2379_v7  ;;  %v3878_v16 = vld [vmem:[#allocation9 + $0x1a8] sm:$0xff]   ;;  %v3880_v31 = vld [vmem:[#allocation9 + $0x1f0] sm:$0xff]   ;;  %v2437_v32 = vrot.slane %v4690_v25, %v4674_v27 }
 0x2b9   : > { %3068 = vmatmul.mubr.bf16.vlgmr.msra.gmra.mrb[0].mxu0 %v2511_v38  ;;  %v2353_v50 = vrot.slane %v2352_v15, 1  ;;  %v2380_v5 = vmul.f32 0.125, %v2372_v54  ;;  %v2425_v38 = vrot.slane %v4690_v25, %v4677_v34  ;;  %v2486_v41 = vrot.slane %v4692_v30, %v4674_v27 }
 0x2ba   : > { %3108 = vmatmul.mubr.bf16.vlgmr.msra.gmra.mrb[0].mxu1 %v2513_v42  ;;  %3688 = vmatpush3.bf16.msra.mxu0 %v3857_v33  ;;  %v2360_v52 = vadd.f32 %v2359_v47, %v2358_v44  ;;  %v2433_v42 = vrot.slane %v4690_v25, %v4680_v36  ;;  %v3883_v44 = vld [vmem:[#allocation9 + $0x178] sm:$0xff]   ;;  %v2474_v46 = vrot.slane %v4692_v30, %v4677_v34 }
 0x2bb   : > { %3710 = vmatpush3.bf16.msra.mxu1 %v3858_v21  ;;  %3689 = vmatprep.subr.bf16.mxu0 %v3859_v39  ;;  %v2354_v24 = vadd.f32 %v2353_v50, %v2352_v15  ;;  %v2388_v58 = vadd.f32 1e-05, %v2380_v5  ;;  %v3881_v39 = vld [vmem:[#allocation9 + $0x130] sm:$0xff]   ;;  %v3884_v15 = vld [vmem:[#allocation9 + $0x1f8] sm:$0xff]   ;;  %v2482_v27 = vrot.slane %v4692_v30, %v4680_v36 }
 0x2bc   : > { %3711 = vmatprep.subr.bf16.mxu1 %v3860_v43  ;;  %v2378_v26 = vmul.f32 0.125, %v2360_v52 }
 0x2bd   : > { %v2377_v1 = vmul.f32 0.125, %v2354_v24 }
 0x2be   : > { %3690 = vmatpush3.bf16.msra.mxu0 %v3861_v12  ;;  %v2386_v22 = vadd.f32 1e-05, %v2378_v26  ;;  %v3571_v26 = vld [vmem:[#allocation8 + $0x3] ss:$0 sm:$0xff] }
 0x2bf   : > { %3712 = vmatpush3.bf16.msra.mxu1 %v3862_v49  ;;  %3691 = vmatprep.subr.bf16.mxu0 %v3863_v20  ;;  %v2385_v2 = vadd.f32 1e-05, %v2377_v1 }
 0x2c0   : > { %3713 = vmatprep.subr.bf16.mxu1 %v3864_v51  ;;  %3895 = vrsqrt.f32 %v2386_v22 }
 0x2c1   : > { %3897 = vrsqrt.f32 %v2388_v58 }
 0x2c2   : > { %3692 = vmatpush3.bf16.msra.mxu0 %v3865_v56  ;;  %3899 = vrsqrt.f32 %v2385_v2 }
 0x2c3   : > { %3714 = vmatpush3.bf16.msra.mxu1 %v3866_v63  ;;  %3693 = vmatprep.subr.bf16.mxu0 %v3867_v29  ;;  %3901 = vrsqrt.f32 %v2387_v3 }
 0x2c4   : > { %3715 = vmatprep.subr.bf16.mxu1 %v3868_v28 }
 0x2c6   : > { %3694 = vmatpush3.bf16.msra.mxu0 %v3869_v59 }
 0x2c7   : > { %3716 = vmatpush3.bf16.msra.mxu1 %v3870_v10  ;;  %3695 = vmatprep.subr.bf16.mxu0 %v3871_v6 }
 0x2c8   : > { %3717 = vmatprep.subr.bf16.mxu1 %v3872_v8 }
 0x2ca   : > { %3696 = vmatpush3.bf16.msra.mxu0 %v3873_v9  ;;  %v3896_v23 = vpop.eup %3895 }
 0x2cb   : > { %3718 = vmatpush3.bf16.msra.mxu1 %v3874_v60  ;;  %3697 = vmatprep.subr.bf16.mxu0 %v3875_v11  ;;  %v3898_v33 = vpop.eup %3897  ;;  %v2402_v35 = vmul.f32 %v3896_v23, %v4712_v55  ;;  %v3882_v55 = vld [vmem:[#allocation9 + $0x1b0] sm:$0xff]  }
 0x2cc   : > { %3719 = vmatprep.subr.bf16.mxu1 %v3876_v13  ;;  %v3900_v21 = vpop.eup %3899  ;;  %v2404_v40 = vmul.f32 %v3898_v33, %v4715_v62 }
 0x2cd   : > { %v3902_v43 = vpop.eup %3901  ;;  %v2451_v18 = vmul.f32 %v2429_v19, %v2402_v35  ;;  %v2401_v45 = vmul.f32 %v3900_v21, %v4717_v4  ;;  %v3886_v4 = vld [vmem:[#allocation9 + $0x1b8] sm:$0xff]  }
 0x2ce   : > { %3698 = vmatpush3.bf16.msra.mxu0 %v3877_v14  ;;  %v2453_v62 = vmul.f32 %v2437_v32, %v2404_v40  ;;  %v2403_v12 = vmul.f32 %v3902_v43, %v4722_v0 }
 0x2cf   : > { %3720 = vmatpush3.bf16.msra.mxu1 %v3878_v16  ;;  %3699 = vmatprep.subr.bf16.mxu0 %v3879_v17  ;;  %v2500_v25 = vadd.f32 %v2478_v37, %v2451_v18  ;;  %v2450_v47 = vmul.f32 %v2425_v38, %v2401_v45 }
 0x2d0   : > { %3721 = vmatprep.subr.bf16.mxu1 %v3880_v31  ;;  %v2502_v49 = vadd.f32 %v2486_v41, %v2453_v62  ;;  %v2452_v20 = vmul.f32 %v2433_v42, %v2403_v12 }
 0x2d1   : > { %v2508_v57 = vmax.f32 %v2500_v25, 0.0  ;;  %v2499_v50 = vadd.f32 %v2474_v46, %v2450_v47 }
 0x2d2   : > { %3700 = vmatpush3.bf16.msra.mxu0 %v3881_v39  ;;  %v2510_v34 = vmax.f32 %v2502_v49, 0.0  ;;  %v2501_v51 = vadd.f32 %v2482_v27, %v2452_v20 }
 0x2d3   : > { %3722 = vmatpush3.bf16.msra.mxu1 %v3882_v55  ;;  %3701 = vmatprep.subr.bf16.mxu0 %v3883_v44  ;;  %v2516_v52 = vpack.c.bf16 %v2508_v57, %v2508_v57  ;;  %v2507_v53 = vmax.f32 %v2499_v50, 0.0 }
 0x2d4   : > { %3723 = vmatprep.subr.bf16.mxu1 %v3884_v15  ;;  %v2518_v0 = vpack.c.bf16 %v2510_v34, %v2510_v34  ;;  %v2509_v54 = vmax.f32 %v2501_v51, 0.0 }
 0x2d5   : > { %3147 = vmatprep.mubr.bf16.mxu0 %v2516_v52  ;;  %v2515_v36 = vpack.c.bf16 %v2507_v53, %v2507_v53 }
 0x2d6   : > { %3702 = vmatpush3.bf16.msra.mxu0 %v3885_v48  ;;  %3187 = vmatprep.mubr.bf16.mxu1 %v2518_v0  ;;  %v2517_v30 = vpack.c.bf16 %v2509_v54, %v2509_v54 }
 0x2d7   : > { %3724 = vmatpush3.bf16.msra.mxu1 %v3886_v4 }
 0x2d9   : > { %3148 = vmatmul.mubr.bf16.vlgmr.msra.gmra.mrb[4].mxu0 %v2515_v36 }
 0x2da   : > { %3188 = vmatmul.mubr.bf16.vlgmr.msra.gmra.mrb[4].mxu1 %v2517_v30 }
 0x38c   : > { %v3659_v24 = vpop.f32.mrb[0].mxu0 }
 0x38d   : > { %v3681_v56 = vpop.f32.mrb[0].mxu1  ;;  %v3660_v61 = vpop.f32.mrb[1].mxu0 }
 0x38e   : > { %v3661_v63 = vadd.f32 %v3660_v61, %v3659_v24  ;;  %v3682_v29 = vpop.f32.mrb[1].mxu1  ;;  %v3662_v5 = vpop.f32.mrb[2].mxu0 }
 0x38f   : > { %v3683_v1 = vadd.f32 %v3682_v29, %v3681_v56  ;;  %v3684_v28 = vpop.f32.mrb[2].mxu1  ;;  %v3663_v22 = vpop.f32.mrb[3].mxu0 }
 0x390   : > { %v3070_v7 = vadd.f32 %v3661_v63, %v3571_v26  ;;  %v3685_v58 = vpop.f32.mrb[3].mxu1 }
 0x392   : > { %v3110_v2 = vadd.f32 %v3683_v1, %v3070_v7 }
 0x3ac   : > { %v3703_v59 = vpop.f32.mrb[4].mxu0 }
 0x3ad   : > { %v3725_v3 = vpop.f32.mrb[4].mxu1  ;;  %v3704_v10 = vpop.f32.mrb[5].mxu0 }
 0x3ae   : > { %v3705_v6 = vadd.f32 %v3704_v10, %v3703_v59  ;;  %v3726_v8 = vpop.f32.mrb[5].mxu1  ;;  %v3706_v9 = vpop.f32.mrb[6].mxu0 }
 0x3af   : > { %v3727_v60 = vadd.f32 %v3726_v8, %v3725_v3  ;;  %v3728_v11 = vpop.f32.mrb[6].mxu1  ;;  %v3707_v13 = vpop.f32.mrb[7].mxu0 }
 0x3b0   : > { %v3150_v14 = vadd.f32 %v3705_v6, %v3110_v2  ;;  %v3729_v16 = vpop.f32.mrb[7].mxu1 }
 0x3b2   : > { %v3190_v17 = vadd.f32 %v3727_v60, %v3150_v14 }
 0x3b4   : > { %3195 = vst [vmem:[#allocation11] sm:$0xff] %v3190_v17 }
 0x3b5 PF: > { %p3782_p2 = scmp.eq.s32.totalorder %s4150_s19, 3  ;;  %s4105_s20 = smov [#allocation11]  }
 0x3b6   : > { %s3203_s21 = sshll.u32 %s4105_s20, 4  ;;  %s3204_s21 = int_to_ptr.vmem [resolvable:$true] %s3203_s21 }
 0x3b7   : > { %s4019_s6 = scalar_lea.vmem %s3204_s21, 128  ;;  %p4026_p9 = scmp.lt.s32.totalorder %s3204_s21, %s3204_s21 }
 0x3b8   : > { %p4020_p13 = scmp.ne.s32.totalorder %s3204_s21, %s4019_s6  ;;  %p4027_p11 = scmp.lt.s32.totalorder %s4019_s6, %s4019_s6 }
 0x3ba   : > { %p4021_p3 = pnand %p4020_p13, %p3782_p2  ;;  %p4028_p7 = por %p4027_p11, %p4026_p9 }
 0x3bc   : > { %p4022_p10 = pneg %p4021_p3 }
 0x3be   : > { %p4029_p8 = pnand %p4028_p7, %p4022_p10 }
 0x3c0   : > { %4032 = shalt.err (!%p4029_p8)
}
 0x3c1   : > { %s4033_s14 = scalar_lea.hbm %s4790_s4, 128 }
 0x3c2   : > { %p4034_p1 = scmp.ne.s32.totalorder %s4790_s4, %s4033_s14  ;;  %p4039_p6 = scmp.lt.u32.totalorder %s4033_s14, %s4790_s4 }
 0x3c4   : > { %p4035_p4 = pnand %p4034_p1, %p3782_p2 }
 0x3c6   : > { %p4036_p5 = pneg %p4035_p4 }
 0x3c8   : > { %p4041_p12 = pnand %p4039_p6, %p4036_p5 }
 0x3ca   : > { %4044 = shalt.err (!%p4041_p12)
}
 0x3cb   : > { %3760 = dma.vmem_to_hbm [thread:$0]  (%p3782_p2), %s3204_s21, 128, %s4790_s4, [#allocation5]  }
 0x3cc   : > { %4078 = dma.done.wait (%p3782_p2), [#allocation5], 128  }
 0x3cd   : > { %4080 = vsyncadd (%p3782_p2), [#allocation5], 4294967168 }
 0x3ce PF: > { %p19_p0 = scmp.ge.s32.totalorder %s4225_s5, 6   ;;  %s4806_s15 = smov %s4087_s16 }
 0x3cf   : > { %s4807_s16 = smov %s4091_s17  ;;  %s4808_s17 = smov %s4238_s9 }
 0x3d0   : > { %s4809_s18 = smov %s4225_s5  ;;  %21 = sbr.rel (!%p19_p0) target bundleno = 7 (0x7), region = 108 }
 0x3d7   :  { %3216 = vsyncpa [#allocation4], 1 }
 0x3d8   :  { %3218 = vsyncpa [#allocation4 + $0x1], 1 }
 0x3d9   :  { %3219 = vsyncpa [#allocation7], 1 }
 0x3da   :  { %3221 = vsyncpa [#allocation7 + $0x1], 1 }
 0x3db   :  { %3222 = vsyncpa [#allocation10], 1 }
 0x3dc   :  { %3223 = vsyncpa [#allocation5], 1 }
 0x3dd   :  { %3225 = vsyncpa [#allocation5 + $0x1], 1 }

</bundles_post_ra>
